<compile_context>
chip_gen: v5e
topology: v5e:2x2
jax: 0.10.0
libtpu: 0.0.40
codegen_flags: <defaults>
</compile_context>

<pallas_src>
import functools

import jax
import jax.numpy as jnp
from jax.experimental import pallas as pl
from jax.experimental.pallas import tpu as pltpu


# ----------------------------- global config -------------------------------

_TM, _TN, _TK = 512, 512, 1024    # preferred matmul tile edges (v5e/v6e); row tiles of
                                  # full-E panels are re-budgeted below for v7x (64 MiB).

try:                              # scoped VMEM limit ~3/4 of physical (96 MiB cap)
    _VMEM_LIMIT = min(3 * int(pltpu.get_tpu_info().vmem_capacity_bytes) // 4, 96 << 20)
except Exception:                 # no device / older API at import time -> compiler default
    _VMEM_LIMIT = None


def _compiler_params(dimension_semantics):
    kw = dict(dimension_semantics=dimension_semantics)
    if _VMEM_LIMIT is not None:
        kw["vmem_limit_bytes"] = _VMEM_LIMIT
    # TODO(synk): on v7x use pltpu.CORE_PARALLEL on the leading parallel grid axis so both
    # TensorCores are used; kept as "parallel" here for portability across generations.
    return pltpu.CompilerParams(**kw)


# ----------------------------- tiling helpers ------------------------------

def _pick_tile(dim, preferred, align):
    """Largest tile <= preferred that divides `dim` and is a multiple of `align`.
    Falls back to the full dim (always a legal block) when nothing smaller divides."""
    if dim <= preferred:
        return dim
    t = (preferred // align) * align
    while t >= align:
        if dim % t == 0:
            return t
        t -= align
    return dim


def _row_tile(n, width, preferred):
    """Row tile (multiple of 16 for bf16 sublane packing), budgeted so the f32
    accumulator / residual / output row panels of lane-width `width` stay comfortably
    inside VMEM even on v7x (64 MiB physical)."""
    cap = max(16, ((6 << 20) // (4 * width)) // 16 * 16)
    return _pick_tile(n, min(preferred, cap), 16)


def _head_group(num_heads, head_dim, target_lanes=256):
    """Heads per attention grid step: smallest G with G | H and (G*head_dim) % 128 == 0
    that reaches ~target_lanes (lane-dense blocks, few grid steps); falls back to H."""
    best = num_heads
    for g in range(1, num_heads + 1):
        if num_heads % g or (g * head_dim) % 128:
            continue
        best = g
        if g * head_dim >= target_lanes:
            break
    return best


# ----------------------------- LayerNorm epilogue ---------------------------

def _layernorm_rows(y, gamma, beta, out_dtype, eps=1e-5):
    """Row LayerNorm of f32 `y` with one-pass statistics (sum and sum-of-squares)."""
    inv_e = 1.0 / y.shape[-1]
    s1 = jnp.sum(y, axis=-1, keepdims=True)
    s2 = jnp.sum(y * y, axis=-1, keepdims=True)
    mean = s1 * inv_e
    var = s2 * inv_e - mean * mean
    yn = (y - mean) * jax.lax.rsqrt(var + eps)
    return (yn * gamma.astype(jnp.float32) + beta.astype(jnp.float32)).astype(out_dtype)


# ----------------------------- Pallas kernels ------------------------------

def _matmul_kernel(x_ref, w_ref, b_ref, o_ref, acc_ref, *, relu):
    """o = x @ w + b (w pre-transposed to (Din, Dout)); optional ReLU epilogue."""
    @pl.when(pl.program_id(2) == 0)
    def _():
        acc_ref[...] = jnp.zeros_like(acc_ref)

    acc_ref[...] += jnp.dot(x_ref[...], w_ref[...],
                            preferred_element_type=jnp.float32)

    @pl.when(pl.program_id(2) == pl.num_programs(2) - 1)
    def _():
        y = acc_ref[...] + b_ref[...].astype(jnp.float32)
        if relu:
            y = jnp.maximum(y, 0.0)
        o_ref[...] = y.astype(o_ref.dtype)


def _matmul_res_ln_kernel(x_ref, w_ref, b_ref, res_ref, g_ref, beta_ref,
                          o_ref, acc_ref):
    """o = LayerNorm((x @ w + b) + res) * gamma + beta  (LN over the last dim, eps=1e-5)."""
    @pl.when(pl.program_id(1) == 0)
    def _():
        acc_ref[...] = jnp.zeros_like(acc_ref)

    acc_ref[...] += jnp.dot(x_ref[...], w_ref[...],
                            preferred_element_type=jnp.float32)

    @pl.when(pl.program_id(1) == pl.num_programs(1) - 1)
    def _():
        y = (acc_ref[...]
             + b_ref[...].astype(jnp.float32)
             + res_ref[...].astype(jnp.float32))
        o_ref[...] = _layernorm_rows(y, g_ref[...], beta_ref[...], o_ref.dtype)


def _ffn_res_ln_kernel(x_ref, w1_ref, b1_ref, w2_ref, b2_ref, res_ref, g_ref, beta_ref,
                       o_ref, acc_ref):
    """Fused FFN block: acc += relu(x @ W1[:,f] + b1[f]) @ W2[f,:]; on the last f step
    o = LayerNorm(acc + b2 + res) * gamma + beta.  The (N, F) hidden never hits HBM."""
    @pl.when(pl.program_id(1) == 0)
    def _():
        acc_ref[...] = jnp.zeros_like(acc_ref)

    h = jnp.dot(x_ref[...], w1_ref[...], preferred_element_type=jnp.float32)
    h = jnp.maximum(h + b1_ref[...].astype(jnp.float32), 0.0)
    acc_ref[...] += jnp.dot(h.astype(x_ref.dtype), w2_ref[...],
                            preferred_element_type=jnp.float32)

    @pl.when(pl.program_id(1) == pl.num_programs(1) - 1)
    def _():
        y = (acc_ref[...]
             + b2_ref[...].astype(jnp.float32)
             + res_ref[...].astype(jnp.float32))
        o_ref[...] = _layernorm_rows(y, g_ref[...], beta_ref[...], o_ref.dtype)
    # TODO(synk): for very large embed_dim the x @ W1 contraction should also be k-tiled.


def _mha_kernel(q_ref, k_ref, v_ref, o_ref, *, group, head_dim):
    """Softmax attention for one (batch, head-group) pair.  Q is pre-scaled (head_dim**-0.5
    folded into the Q projection weights/bias).  Blocks are lane-dense (len, G*head_dim)."""
    q = q_ref[0]                                   # (Tq, G*hd)
    k = k_ref[0]                                   # (Tk, G*hd)
    v = v_ref[0]                                   # (Tk, G*hd)
    outs = []
    for h in range(group):
        lo, hi = h * head_dim, (h + 1) * head_dim
        qh, kh, vh = q[:, lo:hi], k[:, lo:hi], v[:, lo:hi]
        # QK^T contracting K's minor dim (no materialized transposed K tile).
        s = jax.lax.dot_general(qh, kh, (((1,), (1,)), ((), ())),
                                preferred_element_type=jnp.float32)       # (Tq, Tk) f32
        s = s - jnp.max(s, axis=-1, keepdims=True)
        p = jnp.exp(s)
        p = p * (1.0 / jnp.sum(p, axis=-1, keepdims=True))                # exact softmax
        outs.append(jnp.dot(p.astype(vh.dtype), vh,
                            preferred_element_type=jnp.float32))          # (Tq, hd) f32
    o = outs[0] if group == 1 else jnp.concatenate(outs, axis=-1)
    o_ref[0] = o.astype(o_ref.dtype)
    # TODO(synk): flash-tile over the source length (online softmax, m/l/acc scratch) so
    # the per-head (Tq, Tk) f32 score tile does not bound VMEM on v7x for long sequences.


# ------------------------------ op wrappers --------------------------------

def matmul_bias(x, w, b, *, relu=False, out_dtype=None):
    """x: (N, Din), w: (Din, Dout) pre-transposed, b: (Dout,)  ->  (N, Dout)."""
    N, Din = x.shape
    Dout = w.shape[1]
    out_dtype = out_dtype or x.dtype
    tm = _pick_tile(N, _TM, 16)
    tn = _pick_tile(Dout, _TN, 128)
    tk = _pick_tile(Din, _TK, 128)
    grid = (N // tm, Dout // tn, Din // tk)
    kern = functools.partial(_matmul_kernel, relu=relu)
    return pl.pallas_call(
        kern,
        out_shape=jax.ShapeDtypeStruct((N, Dout), out_dtype),
        grid_spec=pltpu.PrefetchScalarGridSpec(
            num_scalar_prefetch=0,
            grid=grid,
            in_specs=[
                pl.BlockSpec((tm, tk), lambda i, j, k: (i, k)),
                pl.BlockSpec((tk, tn), lambda i, j, k: (k, j)),
                pl.BlockSpec((1, tn), lambda i, j, k: (0, j)),
            ],
            out_specs=pl.BlockSpec((tm, tn), lambda i, j, k: (i, j)),
            scratch_shapes=[pltpu.VMEM((tm, tn), jnp.float32)],
        ),
        compiler_params=_compiler_params(("parallel", "parallel", "arbitrary")),
    )(x, w, b.reshape(1, Dout))


def matmul_bias_res_ln(x, w, b, res, gamma, beta, *, out_dtype=None):
    """LayerNorm((x @ w + b) + res) * gamma + beta.  x: (N, Din), w: (Din, E)."""
    N, Din = x.shape
    E = w.shape[1]
    out_dtype = out_dtype or x.dtype
    tm = _row_tile(N, E, _TM)
    tk = _pick_tile(Din, 512, 128)
    grid = (N // tm, Din // tk)
    return pl.pallas_call(
        _matmul_res_ln_kernel,
        out_shape=jax.ShapeDtypeStruct((N, E), out_dtype),
        grid_spec=pltpu.PrefetchScalarGridSpec(
            num_scalar_prefetch=0,
            grid=grid,
            in_specs=[
                pl.BlockSpec((tm, tk), lambda i, k: (i, k)),
                pl.BlockSpec((tk, E), lambda i, k: (k, 0)),
                pl.BlockSpec((1, E), lambda i, k: (0, 0)),
                pl.BlockSpec((tm, E), lambda i, k: (i, 0)),
                pl.BlockSpec((1, E), lambda i, k: (0, 0)),
                pl.BlockSpec((1, E), lambda i, k: (0, 0)),
            ],
            out_specs=pl.BlockSpec((tm, E), lambda i, k: (i, 0)),
            scratch_shapes=[pltpu.VMEM((tm, E), jnp.float32)],
        ),
        compiler_params=_compiler_params(("parallel", "arbitrary")),
    )(x, w, b.reshape(1, E), res, gamma.reshape(1, E), beta.reshape(1, E))


def ffn_res_ln(x, w1, b1, w2, b2, res, gamma, beta, *, out_dtype=None):
    """LayerNorm(fc2(relu(fc1(x))) + res) * gamma + beta in a single fused kernel."""
    N, E = x.shape
    F = w1.shape[1]
    out_dtype = out_dtype or x.dtype
    tm = _row_tile(N, E, _TM)
    tf = _pick_tile(F, 512, 128)
    grid = (N // tm, F // tf)
    return pl.pallas_call(
        _ffn_res_ln_kernel,
        out_shape=jax.ShapeDtypeStruct((N, E), out_dtype),
        grid_spec=pltpu.PrefetchScalarGridSpec(
            num_scalar_prefetch=0,
            grid=grid,
            in_specs=[
                pl.BlockSpec((tm, E), lambda i, f: (i, 0)),    # x
                pl.BlockSpec((E, tf), lambda i, f: (0, f)),    # W1 panel
                pl.BlockSpec((1, tf), lambda i, f: (0, f)),    # b1 panel
                pl.BlockSpec((tf, E), lambda i, f: (f, 0)),    # W2 panel
                pl.BlockSpec((1, E), lambda i, f: (0, 0)),     # b2
                pl.BlockSpec((tm, E), lambda i, f: (i, 0)),    # residual
                pl.BlockSpec((1, E), lambda i, f: (0, 0)),     # gamma
                pl.BlockSpec((1, E), lambda i, f: (0, 0)),     # beta
            ],
            out_specs=pl.BlockSpec((tm, E), lambda i, f: (i, 0)),
            scratch_shapes=[pltpu.VMEM((tm, E), jnp.float32)],
        ),
        compiler_params=_compiler_params(("parallel", "arbitrary")),
    )(x, w1, b1.reshape(1, F), w2, b2.reshape(1, E), res,
      gamma.reshape(1, E), beta.reshape(1, E))


def _mha(q_src, kv_src, *, batch, q_len, kv_len, num_heads, head_dim,
         q_off, k_off, v_off, out_dtype):
    """Multi-head attention reading head-group column slices of the projection outputs.

    q_src: (B, Tq, Wq) containing Q at column offset q_off;
    kv_src: (B, Tk, Wkv) containing K/V at column offsets k_off / v_off.
    Output: (B, Tq, E) written as lane-dense (Tq, G*head_dim) column blocks."""
    embed = num_heads * head_dim
    group = _head_group(num_heads, head_dim)
    gw = group * head_dim
    qb, kb, vb = q_off // gw, k_off // gw, v_off // gw

    kern = functools.partial(_mha_kernel, group=group, head_dim=head_dim)
    return pl.pallas_call(
        kern,
        out_shape=jax.ShapeDtypeStruct((batch, q_len, embed), out_dtype),
        grid_spec=pltpu.PrefetchScalarGridSpec(
            num_scalar_prefetch=0,
            grid=(batch, num_heads // group),
            in_specs=[
                pl.BlockSpec((1, q_len, gw), lambda b, g: (b, 0, qb + g)),
                pl.BlockSpec((1, kv_len, gw), lambda b, g: (b, 0, kb + g)),
                pl.BlockSpec((1, kv_len, gw), lambda b, g: (b, 0, vb + g)),
            ],
            out_specs=pl.BlockSpec((1, q_len, gw), lambda b, g: (b, 0, g)),
        ),
        compiler_params=_compiler_params(("parallel", "parallel")),
    )(q_src, kv_src, kv_src)


# ------------------------ decoder layer forward -----------------------------

def srp_decoder_layer_forward(x, encoder_out, params, num_heads):
    """x: (T, B, E), encoder_out: (S, B, E) -> (T, B, E).

    Default inference path of SRPDecoderLayerBase: post-norm, no masks, no incremental
    state, compute_c=False, scale_heads/scale_attn=False, dropout = identity."""
    T, B, E = x.shape
    S = encoder_out.shape[0]
    assert E % num_heads == 0
    assert E % 128 == 0, "embed_dim must be a multiple of 128 (pad) for lane-dense blocks"
    hd = E // num_heads
    N = B * T

    # One batch-major transpose in/out (XLA) instead of per-block 5-D head split/merge
    # transposes; all kernels then read/write lane-dense (rows, E) tiles.
    xb = jnp.transpose(x, (1, 0, 2)).reshape(N, E)
    encb = jnp.transpose(encoder_out, (1, 0, 2)).reshape(B * S, E)

    p = params

    # --- self-attention block (post-norm; out-proj + residual + LN fused) ---
    residual = xb
    qkv = matmul_bias(xb, p["self_attn"]["qkv_w"], p["self_attn"]["qkv_b"])      # (N, 3E)
    qkv3 = qkv.reshape(B, T, 3 * E)                                               # free view
    attn = _mha(qkv3, qkv3, batch=B, q_len=T, kv_len=T, num_heads=num_heads,
                head_dim=hd, q_off=0, k_off=E, v_off=2 * E,
                out_dtype=xb.dtype).reshape(N, E)
    xb = matmul_bias_res_ln(attn, p["self_attn"]["out_w"], p["self_attn"]["out_b"],
                            residual, p["self_ln_g"], p["self_ln_b"])

    # --- encoder attention block ---
    residual = xb
    q = matmul_bias(xb, p["enc_attn"]["q_w"], p["enc_attn"]["q_b"])               # (N, E)
    kv = matmul_bias(encb, p["enc_attn"]["kv_w"], p["enc_attn"]["kv_b"])          # (B*S, 2E)
    attn = _mha(q.reshape(B, T, E), kv.reshape(B, S, 2 * E), batch=B, q_len=T,
                kv_len=S, num_heads=num_heads, head_dim=hd,
                q_off=0, k_off=0, v_off=E, out_dtype=xb.dtype).reshape(N, E)
    xb = matmul_bias_res_ln(attn, p["enc_attn"]["out_w"], p["enc_attn"]["out_b"],
                            residual, p["enc_ln_g"], p["enc_ln_b"])

    # --- feed-forward block: fc1 -> relu -> fc2 -> +residual -> LN in ONE kernel ---
    xb = ffn_res_ln(xb, p["fc1_w"], p["fc1_b"], p["fc2_w"], p["fc2_b"],
                    xb, p["final_ln_g"], p["final_ln_b"])

    return jnp.transpose(xb.reshape(B, T, E), (1, 0, 2))


# ------------------------------- params -------------------------------------

def init_params(key, embed_dim, ffn_dim, num_heads, dtype=jnp.bfloat16):
    """Weights pre-transposed to (Din, Dout); self-attn QKV and cross-attn KV fused; the
    head_dim**-0.5 query scaling folded into BOTH the Q weight and Q bias."""
    e = embed_dim
    hd = e // num_heads
    scaling = hd ** -0.5
    keys = iter(jax.random.split(key, 24))

    def w(din, dout):
        return 0.02 * jax.random.normal(next(keys), (din, dout), jnp.float32)

    def b(d):
        return 0.02 * jax.random.normal(next(keys), (d,), jnp.float32)

    self_attn = {
        "qkv_w": jnp.concatenate([w(e, e) * scaling, w(e, e), w(e, e)], axis=1).astype(dtype),
        "qkv_b": jnp.concatenate([b(e) * scaling, b(e), b(e)]),
        "out_w": w(e, e).astype(dtype),
        "out_b": b(e),
    }
    enc_attn = {
        "q_w": (w(e, e) * scaling).astype(dtype),
        "q_b": b(e) * scaling,
        "kv_w": jnp.concatenate([w(e, e), w(e, e)], axis=1).astype(dtype),
        "kv_b": jnp.concatenate([b(e), b(e)]),
        "out_w": w(e, e).astype(dtype),
        "out_b": b(e),
    }
    ones_e = jnp.ones((e,), jnp.float32)
    zeros_e = jnp.zeros((e,), jnp.float32)
    return {
        "self_attn": self_attn,
        "enc_attn": enc_attn,
        "self_ln_g": ones_e, "self_ln_b": zeros_e,
        "enc_ln_g": ones_e, "enc_ln_b": zeros_e,
        "fc1_w": w(e, ffn_dim).astype(dtype), "fc1_b": b(ffn_dim),
        "fc2_w": w(ffn_dim, e).astype(dtype), "fc2_b": b(e),
        "final_ln_g": ones_e, "final_ln_b": zeros_e,
    }


# -------------------------------- main ---------------------------------------

if __name__ == "__main__":
    T, S, B = 8, 8, 2            # tgt seq, src seq, batch
    E, H, F = 128, 4, 256        # embed_dim (multiple of 128), heads, ffn_embed_dim

    key = jax.random.PRNGKey(0)
    k_x, k_enc, k_p = jax.random.split(key, 3)

    x = jax.random.normal(k_x, (T, B, E), dtype=jnp.float32).astype(jnp.bfloat16)
    encoder_out = jax.random.normal(k_enc, (S, B, E), dtype=jnp.float32).astype(jnp.bfloat16)
    params = init_params(k_p, E, F, num_heads=H, dtype=jnp.bfloat16)

    fwd = jax.jit(functools.partial(srp_decoder_layer_forward, num_heads=H))
    out = jax.block_until_ready(fwd(x, encoder_out, params))

    assert out.shape == (T, B, E)
    assert jnp.all(jnp.isfinite(out.astype(jnp.float32)))
    print("KERNEL_OK")
</pallas_src>

<mosaic_0001>
module attributes {stable_mosaic.version = 11 : i64} {
  func.func @_matmul_kernel(%arg0: i32, %arg1: i32, %arg2: i32, %arg3: memref<16x128xbf16, #tpu.memory_space<vmem>>, %arg4: memref<128x384xbf16, #tpu.memory_space<vmem>>, %arg5: memref<1x384xf32, #tpu.memory_space<vmem>>, %arg6: memref<16x384xbf16, #tpu.memory_space<vmem>>, %arg7: memref<16x384xf32, #tpu.memory_space<vmem>>) attributes {dimension_semantics = [#tpu.dimension_semantics<parallel>, #tpu.dimension_semantics<parallel>, #tpu.dimension_semantics<arbitrary>], iteration_bounds = array<i64: 1, 1, 1>, scalar_prefetch = 0 : i64, scratch_operands = 1 : i64, tpu.core_type = #tpu.core_type<tc>, window_params = [{transform_indices = @transform_0, window_bounds = array<i64: 16, 128>}, {transform_indices = @transform_1, window_bounds = array<i64: 128, 384>}, {transform_indices = @transform_2, window_bounds = array<i64: 1, 384>}, {transform_indices = @transform_3, window_bounds = array<i64: 16, 384>}]} {
    %c0_i32 = arith.constant 0 : i32
    %0 = arith.cmpi eq, %arg2, %c0_i32 : i32
    %1 = arith.extui %0 : i1 to i32
    %c0_i32_0 = arith.constant 0 : i32
    %2 = arith.cmpi ne, %1, %c0_i32_0 : i32
    scf.if %2 {
      %cst_10 = arith.constant 0.000000e+00 : f32
      %12 = vector.broadcast %cst_10 : f32 to vector<16x384xf32>
      %c0_11 = arith.constant 0 : index
      %c0_12 = arith.constant 0 : index
      %13 = vector.load %arg7[%c0_11, %c0_12] : memref<16x384xf32, #tpu.memory_space<vmem>>, vector<16x384xf32>
      tpu.vector_store %arg7[%c0_11, %c0_12], %12 {strides = array<i32>} : memref<16x384xf32, #tpu.memory_space<vmem>>, vector<16x384xf32>,
    } else {
    }
    %c0 = arith.constant 0 : index
    %c0_1 = arith.constant 0 : index
    %3 = vector.load %arg7[%c0, %c0_1] : memref<16x384xf32, #tpu.memory_space<vmem>>, vector<16x384xf32>
    %c0_2 = arith.constant 0 : index
    %c0_3 = arith.constant 0 : index
    %4 = vector.load %arg3[%c0_2, %c0_3] : memref<16x128xbf16, #tpu.memory_space<vmem>>, vector<16x128xbf16>
    %c0_4 = arith.constant 0 : index
    %c0_5 = arith.constant 0 : index
    %5 = vector.load %arg4[%c0_4, %c0_5] : memref<128x384xbf16, #tpu.memory_space<vmem>>, vector<128x384xbf16>
    %cst = arith.constant dense<0.000000e+00> : vector<16x384xf32>
    %6 = tpu.matmul %4, %5, %cst {dimension_numbers = #tpu.dot_dimension_numbers<[1], [0], [0], [1], [0, 0, 1, 1], [], []>} : vector<16x128xbf16>, vector<128x384xbf16>, vector<16x384xf32> -> vector<16x384xf32>
    %7 = arith.addf %3, %6 : vector<16x384xf32>
    %c0_6 = arith.constant 0 : index
    %c0_7 = arith.constant 0 : index
    %8 = vector.load %arg7[%c0_6, %c0_7] : memref<16x384xf32, #tpu.memory_space<vmem>>, vector<16x384xf32>
    tpu.vector_store %arg7[%c0_6, %c0_7], %7 {strides = array<i32>} : memref<16x384xf32, #tpu.memory_space<vmem>>, vector<16x384xf32>,
    %c0_i32_8 = arith.constant 0 : i32
    %9 = arith.cmpi eq, %arg2, %c0_i32_8 : i32
    %10 = arith.extui %9 : i1 to i32
    %c0_i32_9 = arith.constant 0 : i32
    %11 = arith.cmpi ne, %10, %c0_i32_9 : i32
    scf.if %11 {
      %c0_10 = arith.constant 0 : index
      %c0_11 = arith.constant 0 : index
      %12 = vector.load %arg7[%c0_10, %c0_11] : memref<16x384xf32, #tpu.memory_space<vmem>>, vector<16x384xf32>
      %c0_12 = arith.constant 0 : index
      %c0_13 = arith.constant 0 : index
      %13 = vector.load %arg5[%c0_12, %c0_13] : memref<1x384xf32, #tpu.memory_space<vmem>>, vector<1x384xf32>
      %14 = vector.broadcast %13 : vector<1x384xf32> to vector<16x384xf32>
      %15 = arith.addf %12, %14 : vector<16x384xf32>
      %16 = arith.truncf %15 : vector<16x384xf32> to vector<16x384xbf16>
      %c0_14 = arith.constant 0 : index
      %c0_15 = arith.constant 0 : index
      %17 = vector.load %arg6[%c0_14, %c0_15] : memref<16x384xbf16, #tpu.memory_space<vmem>>, vector<16x384xbf16>
      tpu.vector_store %arg6[%c0_14, %c0_15], %16 {strides = array<i32>} : memref<16x384xbf16, #tpu.memory_space<vmem>>, vector<16x384xbf16>,
    } else {
    }
    return
  }
  func.func @transform_0(%arg0: i32, %arg1: i32, %arg2: i32) -> (i32, i32) {
    %c0_i32 = arith.constant 0 : i32
    return %arg0, %arg2 : i32, i32
  }
  func.func @transform_1(%arg0: i32, %arg1: i32, %arg2: i32) -> (i32, i32) {
    %c0_i32 = arith.constant 0 : i32
    return %arg2, %arg1 : i32, i32
  }
  func.func @transform_2(%arg0: i32, %arg1: i32, %arg2: i32) -> (i32, i32) {
    %c0_i32 = arith.constant 0 : i32
    %c0_i32_0 = arith.constant 0 : i32
    return %c0_i32, %arg1 : i32, i32
  }
  func.func @transform_3(%arg0: i32, %arg1: i32, %arg2: i32) -> (i32, i32) {
    %c0_i32 = arith.constant 0 : i32
    return %arg0, %arg1 : i32, i32
  }
}

module attributes {stable_mosaic.version = 11 : i64} {
  func.func @_mha_kernel(%arg0: i32, %arg1: i32, %arg2: memref<1x8x128xbf16, #tpu.memory_space<vmem>>, %arg3: memref<1x8x128xbf16, #tpu.memory_space<vmem>>, %arg4: memref<1x8x128xbf16, #tpu.memory_space<vmem>>, %arg5: memref<1x8x128xbf16, #tpu.memory_space<vmem>>) attributes {dimension_semantics = [#tpu.dimension_semantics<parallel>, #tpu.dimension_semantics<parallel>], iteration_bounds = array<i64: 2, 1>, scalar_prefetch = 0 : i64, scratch_operands = 0 : i64, tpu.core_type = #tpu.core_type<tc>, window_params = [{transform_indices = @transform_0, window_bounds = array<i64: 1, 8, 128>}, {transform_indices = @transform_1, window_bounds = array<i64: 1, 8, 128>}, {transform_indices = @transform_2, window_bounds = array<i64: 1, 8, 128>}, {transform_indices = @transform_3, window_bounds = array<i64: 1, 8, 128>}]} {
    %c0 = arith.constant 0 : index
    %c0_0 = arith.constant 0 : index
    %c0_1 = arith.constant 0 : index
    %0 = vector.load %arg2[%c0, %c0_0, %c0_1] : memref<1x8x128xbf16, #tpu.memory_space<vmem>>, vector<1x8x128xbf16>
    %1 = vector.shape_cast %0 : vector<1x8x128xbf16> to vector<8x128xbf16>
    %c0_2 = arith.constant 0 : index
    %c0_3 = arith.constant 0 : index
    %c0_4 = arith.constant 0 : index
    %2 = vector.load %arg3[%c0_2, %c0_3, %c0_4] : memref<1x8x128xbf16, #tpu.memory_space<vmem>>, vector<1x8x128xbf16>
    %3 = vector.shape_cast %2 : vector<1x8x128xbf16> to vector<8x128xbf16>
    %c0_5 = arith.constant 0 : index
    %c0_6 = arith.constant 0 : index
    %c0_7 = arith.constant 0 : index
    %4 = vector.load %arg4[%c0_5, %c0_6, %c0_7] : memref<1x8x128xbf16, #tpu.memory_space<vmem>>, vector<1x8x128xbf16>
    %5 = vector.shape_cast %4 : vector<1x8x128xbf16> to vector<8x128xbf16>
    %6 = vector.extract_strided_slice %1 {offsets = [0, 0], sizes = [8, 32], strides = [1, 1]} : vector<8x128xbf16> to vector<8x32xbf16>
    %7 = vector.extract_strided_slice %3 {offsets = [0, 0], sizes = [8, 32], strides = [1, 1]} : vector<8x128xbf16> to vector<8x32xbf16>
    %8 = vector.extract_strided_slice %5 {offsets = [0, 0], sizes = [8, 32], strides = [1, 1]} : vector<8x128xbf16> to vector<8x32xbf16>
    %cst = arith.constant dense<0.000000e+00> : vector<8x8xf32>
    %9 = tpu.matmul %6, %7, %cst {dimension_numbers = #tpu.dot_dimension_numbers<[1], [1], [0], [0], [0, 0, 1, 0], [], []>} : vector<8x32xbf16>, vector<8x32xbf16>, vector<8x8xf32> -> vector<8x8xf32>
    %cst_8 = arith.constant dense<0xFF800000> : vector<8xf32>
    %10 = vector.multi_reduction <maximumf>, %9, %cst_8 [1] : vector<8x8xf32> to vector<8xf32>
    %11 = vector.shape_cast %10 : vector<8xf32> to vector<8x1xf32>
    %12 = vector.broadcast %11 : vector<8x1xf32> to vector<8x8xf32>
    %13 = arith.subf %9, %12 : vector<8x8xf32>
    %14 = math.exp %13 : vector<8x8xf32>
    %cst_9 = arith.constant dense<0.000000e+00> : vector<8xf32>
    %15 = vector.multi_reduction <add>, %14, %cst_9 [1] : vector<8x8xf32> to vector<8xf32>
    %16 = vector.shape_cast %15 : vector<8xf32> to vector<8x1xf32>
    %cst_10 = arith.constant 1.000000e+00 : f32
    %17 = vector.broadcast %cst_10 : f32 to vector<8x1xf32>
    %18 = arith.divf %17, %16 : vector<8x1xf32>
    %19 = vector.broadcast %18 : vector<8x1xf32> to vector<8x8xf32>
    %20 = arith.mulf %14, %19 : vector<8x8xf32>
    %21 = arith.truncf %20 : vector<8x8xf32> to vector<8x8xbf16>
    %cst_11 = arith.constant dense<0.000000e+00> : vector<8x32xf32>
    %22 = tpu.matmul %21, %8, %cst_11 {dimension_numbers = #tpu.dot_dimension_numbers<[1], [0], [0], [1], [0, 0, 1, 1], [], []>} : vector<8x8xbf16>, vector<8x32xbf16>, vector<8x32xf32> -> vector<8x32xf32>
    %23 = vector.extract_strided_slice %1 {offsets = [0, 32], sizes = [8, 32], strides = [1, 1]} : vector<8x128xbf16> to vector<8x32xbf16>
    %24 = vector.extract_strided_slice %3 {offsets = [0, 32], sizes = [8, 32], strides = [1, 1]} : vector<8x128xbf16> to vector<8x32xbf16>
    %25 = vector.extract_strided_slice %5 {offsets = [0, 32], sizes = [8, 32], strides = [1, 1]} : vector<8x128xbf16> to vector<8x32xbf16>
    %cst_12 = arith.constant dense<0.000000e+00> : vector<8x8xf32>
    %26 = tpu.matmul %23, %24, %cst_12 {dimension_numbers = #tpu.dot_dimension_numbers<[1], [1], [0], [0], [0, 0, 1, 0], [], []>} : vector<8x32xbf16>, vector<8x32xbf16>, vector<8x8xf32> -> vector<8x8xf32>
    %cst_13 = arith.constant dense<0xFF800000> : vector<8xf32>
    %27 = vector.multi_reduction <maximumf>, %26, %cst_13 [1] : vector<8x8xf32> to vector<8xf32>
    %28 = vector.shape_cast %27 : vector<8xf32> to vector<8x1xf32>
    %29 = vector.broadcast %28 : vector<8x1xf32> to vector<8x8xf32>
    %30 = arith.subf %26, %29 : vector<8x8xf32>
    %31 = math.exp %30 : vector<8x8xf32>
    %cst_14 = arith.constant dense<0.000000e+00> : vector<8xf32>
    %32 = vector.multi_reduction <add>, %31, %cst_14 [1] : vector<8x8xf32> to vector<8xf32>
    %33 = vector.shape_cast %32 : vector<8xf32> to vector<8x1xf32>
    %cst_15 = arith.constant 1.000000e+00 : f32
    %34 = vector.broadcast %cst_15 : f32 to vector<8x1xf32>
    %35 = arith.divf %34, %33 : vector<8x1xf32>
    %36 = vector.broadcast %35 : vector<8x1xf32> to vector<8x8xf32>
    %37 = arith.mulf %31, %36 : vector<8x8xf32>
    %38 = arith.truncf %37 : vector<8x8xf32> to vector<8x8xbf16>
    %cst_16 = arith.constant dense<0.000000e+00> : vector<8x32xf32>
    %39 = tpu.matmul %38, %25, %cst_16 {dimension_numbers = #tpu.dot_dimension_numbers<[1], [0], [0], [1], [0, 0, 1, 1], [], []>} : vector<8x8xbf16>, vector<8x32xbf16>, vector<8x32xf32> -> vector<8x32xf32>
    %40 = vector.extract_strided_slice %1 {offsets = [0, 64], sizes = [8, 32], strides = [1, 1]} : vector<8x128xbf16> to vector<8x32xbf16>
    %41 = vector.extract_strided_slice %3 {offsets = [0, 64], sizes = [8, 32], strides = [1, 1]} : vector<8x128xbf16> to vector<8x32xbf16>
    %42 = vector.extract_strided_slice %5 {offsets = [0, 64], sizes = [8, 32], strides = [1, 1]} : vector<8x128xbf16> to vector<8x32xbf16>
    %cst_17 = arith.constant dense<0.000000e+00> : vector<8x8xf32>
    %43 = tpu.matmul %40, %41, %cst_17 {dimension_numbers = #tpu.dot_dimension_numbers<[1], [1], [0], [0], [0, 0, 1, 0], [], []>} : vector<8x32xbf16>, vector<8x32xbf16>, vector<8x8xf32> -> vector<8x8xf32>
    %cst_18 = arith.constant dense<0xFF800000> : vector<8xf32>
    %44 = vector.multi_reduction <maximumf>, %43, %cst_18 [1] : vector<8x8xf32> to vector<8xf32>
    %45 = vector.shape_cast %44 : vector<8xf32> to vector<8x1xf32>
    %46 = vector.broadcast %45 : vector<8x1xf32> to vector<8x8xf32>
    %47 = arith.subf %43, %46 : vector<8x8xf32>
    %48 = math.exp %47 : vector<8x8xf32>
    %cst_19 = arith.constant dense<0.000000e+00> : vector<8xf32>
    %49 = vector.multi_reduction <add>, %48, %cst_19 [1] : vector<8x8xf32> to vector<8xf32>
    %50 = vector.shape_cast %49 : vector<8xf32> to vector<8x1xf32>
    %cst_20 = arith.constant 1.000000e+00 : f32
    %51 = vector.broadcast %cst_20 : f32 to vector<8x1xf32>
    %52 = arith.divf %51, %50 : vector<8x1xf32>
    %53 = vector.broadcast %52 : vector<8x1xf32> to vector<8x8xf32>
    %54 = arith.mulf %48, %53 : vector<8x8xf32>
    %55 = arith.truncf %54 : vector<8x8xf32> to vector<8x8xbf16>
    %cst_21 = arith.constant dense<0.000000e+00> : vector<8x32xf32>
    %56 = tpu.matmul %55, %42, %cst_21 {dimension_numbers = #tpu.dot_dimension_numbers<[1], [0], [0], [1], [0, 0, 1, 1], [], []>} : vector<8x8xbf16>, vector<8x32xbf16>, vector<8x32xf32> -> vector<8x32xf32>
    %57 = vector.extract_strided_slice %1 {offsets = [0, 96], sizes = [8, 32], strides = [1, 1]} : vector<8x128xbf16> to vector<8x32xbf16>
    %58 = vector.extract_strided_slice %3 {offsets = [0, 96], sizes = [8, 32], strides = [1, 1]} : vector<8x128xbf16> to vector<8x32xbf16>
    %59 = vector.extract_strided_slice %5 {offsets = [0, 96], sizes = [8, 32], strides = [1, 1]} : vector<8x128xbf16> to vector<8x32xbf16>
    %cst_22 = arith.constant dense<0.000000e+00> : vector<8x8xf32>
    %60 = tpu.matmul %57, %58, %cst_22 {dimension_numbers = #tpu.dot_dimension_numbers<[1], [1], [0], [0], [0, 0, 1, 0], [], []>} : vector<8x32xbf16>, vector<8x32xbf16>, vector<8x8xf32> -> vector<8x8xf32>
    %cst_23 = arith.constant dense<0xFF800000> : vector<8xf32>
    %61 = vector.multi_reduction <maximumf>, %60, %cst_23 [1] : vector<8x8xf32> to vector<8xf32>
    %62 = vector.shape_cast %61 : vector<8xf32> to vector<8x1xf32>
    %63 = vector.broadcast %62 : vector<8x1xf32> to vector<8x8xf32>
    %64 = arith.subf %60, %63 : vector<8x8xf32>
    %65 = math.exp %64 : vector<8x8xf32>
    %cst_24 = arith.constant dense<0.000000e+00> : vector<8xf32>
    %66 = vector.multi_reduction <add>, %65, %cst_24 [1] : vector<8x8xf32> to vector<8xf32>
    %67 = vector.shape_cast %66 : vector<8xf32> to vector<8x1xf32>
    %cst_25 = arith.constant 1.000000e+00 : f32
    %68 = vector.broadcast %cst_25 : f32 to vector<8x1xf32>
    %69 = arith.divf %68, %67 : vector<8x1xf32>
    %70 = vector.broadcast %69 : vector<8x1xf32> to vector<8x8xf32>
    %71 = arith.mulf %65, %70 : vector<8x8xf32>
    %72 = arith.truncf %71 : vector<8x8xf32> to vector<8x8xbf16>
    %cst_26 = arith.constant dense<0.000000e+00> : vector<8x32xf32>
    %73 = tpu.matmul %72, %59, %cst_26 {dimension_numbers = #tpu.dot_dimension_numbers<[1], [0], [0], [1], [0, 0, 1, 1], [], []>} : vector<8x8xbf16>, vector<8x32xbf16>, vector<8x32xf32> -> vector<8x32xf32>
    %74 = tpu.concatenate %22, %39, %56, %73 in 1 : vector<8x32xf32>, vector<8x32xf32>, vector<8x32xf32>, vector<8x32xf32> -> vector<8x128xf32>
    %75 = arith.truncf %74 : vector<8x128xf32> to vector<8x128xbf16>
    %c0_27 = arith.constant 0 : index
    %c0_28 = arith.constant 0 : index
    %c0_29 = arith.constant 0 : index
    %76 = vector.load %arg5[%c0_27, %c0_28, %c0_29] : memref<1x8x128xbf16, #tpu.memory_space<vmem>>, vector<1x8x128xbf16>
    %77 = vector.shape_cast %76 : vector<1x8x128xbf16> to vector<8x128xbf16>
    %78 = vector.shape_cast %75 : vector<8x128xbf16> to vector<1x8x128xbf16>
    tpu.vector_store %arg5[%c0_27, %c0_28, %c0_29], %78 {strides = array<i32>} : memref<1x8x128xbf16, #tpu.memory_space<vmem>>, vector<1x8x128xbf16>,
    return
  }
  func.func @transform_0(%arg0: i32, %arg1: i32) -> (i32, i32, i32) {
    %c0_i32 = arith.constant 0 : i32
    %0 = arith.addi %c0_i32, %arg1 : i32
    %c0_i32_0 = arith.constant 0 : i32
    %c0_i32_1 = arith.constant 0 : i32
    return %arg0, %c0_i32_0, %0 : i32, i32, i32
  }
  func.func @transform_1(%arg0: i32, %arg1: i32) -> (i32, i32, i32) {
    %c1_i32 = arith.constant 1 : i32
    %0 = arith.addi %c1_i32, %arg1 : i32
    %c0_i32 = arith.constant 0 : i32
    %c0_i32_0 = arith.constant 0 : i32
    return %arg0, %c0_i32, %0 : i32, i32, i32
  }
  func.func @transform_2(%arg0: i32, %arg1: i32) -> (i32, i32, i32) {
    %c2_i32 = arith.constant 2 : i32
    %0 = arith.addi %c2_i32, %arg1 : i32
    %c0_i32 = arith.constant 0 : i32
    %c0_i32_0 = arith.constant 0 : i32
    return %arg0, %c0_i32, %0 : i32, i32, i32
  }
  func.func @transform_3(%arg0: i32, %arg1: i32) -> (i32, i32, i32) {
    %c0_i32 = arith.constant 0 : i32
    %c0_i32_0 = arith.constant 0 : i32
    return %arg0, %c0_i32, %arg1 : i32, i32, i32
  }
}

module attributes {stable_mosaic.version = 11 : i64} {
  func.func @_matmul_res_ln_kernel(%arg0: i32, %arg1: i32, %arg2: memref<16x128xbf16, #tpu.memory_space<vmem>>, %arg3: memref<128x128xbf16, #tpu.memory_space<vmem>>, %arg4: memref<1x128xf32, #tpu.memory_space<vmem>>, %arg5: memref<16x128xbf16, #tpu.memory_space<vmem>>, %arg6: memref<1x128xf32, #tpu.memory_space<vmem>>, %arg7: memref<1x128xf32, #tpu.memory_space<vmem>>, %arg8: memref<16x128xbf16, #tpu.memory_space<vmem>>, %arg9: memref<16x128xf32, #tpu.memory_space<vmem>>) attributes {dimension_semantics = [#tpu.dimension_semantics<parallel>, #tpu.dimension_semantics<arbitrary>], iteration_bounds = array<i64: 1, 1>, scalar_prefetch = 0 : i64, scratch_operands = 1 : i64, tpu.core_type = #tpu.core_type<tc>, window_params = [{transform_indices = @transform_0, window_bounds = array<i64: 16, 128>}, {transform_indices = @transform_1, window_bounds = array<i64: 128, 128>}, {pipeline_mode = #tpu.pipeline_mode<synchronous>, transform_indices = @transform_2, window_bounds = array<i64: 1, 128>}, {transform_indices = @transform_3, window_bounds = array<i64: 16, 128>}, {pipeline_mode = #tpu.pipeline_mode<synchronous>, transform_indices = @transform_4, window_bounds = array<i64: 1, 128>}, {pipeline_mode = #tpu.pipeline_mode<synchronous>, transform_indices = @transform_5, window_bounds = array<i64: 1, 128>}, {transform_indices = @transform_6, window_bounds = array<i64: 16, 128>}]} {
    %c0_i32 = arith.constant 0 : i32
    %0 = arith.cmpi eq, %arg1, %c0_i32 : i32
    %1 = arith.extui %0 : i1 to i32
    %c0_i32_0 = arith.constant 0 : i32
    %2 = arith.cmpi ne, %1, %c0_i32_0 : i32
    scf.if %2 {
      %cst_10 = arith.constant 0.000000e+00 : f32
      %12 = vector.broadcast %cst_10 : f32 to vector<16x128xf32>
      %c0_11 = arith.constant 0 : index
      %c0_12 = arith.constant 0 : index
      %13 = vector.load %arg9[%c0_11, %c0_12] : memref<16x128xf32, #tpu.memory_space<vmem>>, vector<16x128xf32>
      tpu.vector_store %arg9[%c0_11, %c0_12], %12 {strides = array<i32>} : memref<16x128xf32, #tpu.memory_space<vmem>>, vector<16x128xf32>,
    } else {
    }
    %c0 = arith.constant 0 : index
    %c0_1 = arith.constant 0 : index
    %3 = vector.load %arg9[%c0, %c0_1] : memref<16x128xf32, #tpu.memory_space<vmem>>, vector<16x128xf32>
    %c0_2 = arith.constant 0 : index
    %c0_3 = arith.constant 0 : index
    %4 = vector.load %arg2[%c0_2, %c0_3] : memref<16x128xbf16, #tpu.memory_space<vmem>>, vector<16x128xbf16>
    %c0_4 = arith.constant 0 : index
    %c0_5 = arith.constant 0 : index
    %5 = vector.load %arg3[%c0_4, %c0_5] : memref<128x128xbf16, #tpu.memory_space<vmem>>, vector<128x128xbf16>
    %cst = arith.constant dense<0.000000e+00> : vector<16x128xf32>
    %6 = tpu.matmul %4, %5, %cst {dimension_numbers = #tpu.dot_dimension_numbers<[1], [0], [0], [1], [0, 0, 1, 1], [], []>} : vector<16x128xbf16>, vector<128x128xbf16>, vector<16x128xf32> -> vector<16x128xf32>
    %7 = arith.addf %3, %6 : vector<16x128xf32>
    %c0_6 = arith.constant 0 : index
    %c0_7 = arith.constant 0 : index
    %8 = vector.load %arg9[%c0_6, %c0_7] : memref<16x128xf32, #tpu.memory_space<vmem>>, vector<16x128xf32>
    tpu.vector_store %arg9[%c0_6, %c0_7], %7 {strides = array<i32>} : memref<16x128xf32, #tpu.memory_space<vmem>>, vector<16x128xf32>,
    %c0_i32_8 = arith.constant 0 : i32
    %9 = arith.cmpi eq, %arg1, %c0_i32_8 : i32
    %10 = arith.extui %9 : i1 to i32
    %c0_i32_9 = arith.constant 0 : i32
    %11 = arith.cmpi ne, %10, %c0_i32_9 : i32
    scf.if %11 {
      %c0_10 = arith.constant 0 : index
      %c0_11 = arith.constant 0 : index
      %12 = vector.load %arg9[%c0_10, %c0_11] : memref<16x128xf32, #tpu.memory_space<vmem>>, vector<16x128xf32>
      %c0_12 = arith.constant 0 : index
      %c0_13 = arith.constant 0 : index
      %13 = vector.load %arg4[%c0_12, %c0_13] : memref<1x128xf32, #tpu.memory_space<vmem>>, vector<1x128xf32>
      %14 = vector.broadcast %13 : vector<1x128xf32> to vector<16x128xf32>
      %15 = arith.addf %12, %14 : vector<16x128xf32>
      %c0_14 = arith.constant 0 : index
      %c0_15 = arith.constant 0 : index
      %16 = vector.load %arg5[%c0_14, %c0_15] : memref<16x128xbf16, #tpu.memory_space<vmem>>, vector<16x128xbf16>
      %17 = arith.extf %16 : vector<16x128xbf16> to vector<16x128xf32>
      %18 = arith.addf %15, %17 : vector<16x128xf32>
      %c0_16 = arith.constant 0 : index
      %c0_17 = arith.constant 0 : index
      %19 = vector.load %arg6[%c0_16, %c0_17] : memref<1x128xf32, #tpu.memory_space<vmem>>, vector<1x128xf32>
      %c0_18 = arith.constant 0 : index
      %c0_19 = arith.constant 0 : index
      %20 = vector.load %arg7[%c0_18, %c0_19] : memref<1x128xf32, #tpu.memory_space<vmem>>, vector<1x128xf32>
      %cst_20 = arith.constant dense<0.000000e+00> : vector<16xf32>
      %21 = vector.multi_reduction <add>, %18, %cst_20 [1] : vector<16x128xf32> to vector<16xf32>
      %22 = vector.shape_cast %21 : vector<16xf32> to vector<16x1xf32>
      %23 = arith.mulf %18, %18 : vector<16x128xf32>
      %cst_21 = arith.constant dense<0.000000e+00> : vector<16xf32>
      %24 = vector.multi_reduction <add>, %23, %cst_21 [1] : vector<16x128xf32> to vector<16xf32>
      %25 = vector.shape_cast %24 : vector<16xf32> to vector<16x1xf32>
      %cst_22 = arith.constant 7.812500e-03 : f32
      %26 = vector.broadcast %cst_22 : f32 to vector<16x1xf32>
      %27 = arith.mulf %22, %26 : vector<16x1xf32>
      %cst_23 = arith.constant 7.812500e-03 : f32
      %28 = vector.broadcast %cst_23 : f32 to vector<16x1xf32>
      %29 = arith.mulf %25, %28 : vector<16x1xf32>
      %30 = arith.mulf %27, %27 : vector<16x1xf32>
      %31 = arith.subf %29, %30 : vector<16x1xf32>
      %32 = vector.broadcast %27 : vector<16x1xf32> to vector<16x128xf32>
      %33 = arith.subf %18, %32 : vector<16x128xf32>
      %cst_24 = arith.constant 9.99999974E-6 : f32
      %34 = vector.broadcast %cst_24 : f32 to vector<16x1xf32>
      %35 = arith.addf %31, %34 : vector<16x1xf32>
      %36 = math.rsqrt %35 : vector<16x1xf32>
      %37 = vector.broadcast %36 : vector<16x1xf32> to vector<16x128xf32>
      %38 = arith.mulf %33, %37 : vector<16x128xf32>
      %39 = vector.broadcast %19 : vector<1x128xf32> to vector<16x128xf32>
      %40 = arith.mulf %38, %39 : vector<16x128xf32>
      %41 = vector.broadcast %20 : vector<1x128xf32> to vector<16x128xf32>
      %42 = arith.addf %40, %41 : vector<16x128xf32>
      %43 = arith.truncf %42 : vector<16x128xf32> to vector<16x128xbf16>
      %c0_25 = arith.constant 0 : index
      %c0_26 = arith.constant 0 : index
      %44 = vector.load %arg8[%c0_25, %c0_26] : memref<16x128xbf16, #tpu.memory_space<vmem>>, vector<16x128xbf16>
      tpu.vector_store %arg8[%c0_25, %c0_26], %43 {strides = array<i32>} : memref<16x128xbf16, #tpu.memory_space<vmem>>, vector<16x128xbf16>,
    } else {
    }
    return
  }
  func.func @transform_0(%arg0: i32, %arg1: i32) -> (i32, i32) {
    %c0_i32 = arith.constant 0 : i32
    return %arg0, %arg1 : i32, i32
  }
  func.func @transform_1(%arg0: i32, %arg1: i32) -> (i32, i32) {
    %c0_i32 = arith.constant 0 : i32
    %c0_i32_0 = arith.constant 0 : i32
    return %arg1, %c0_i32 : i32, i32
  }
  func.func @transform_2(%arg0: i32, %arg1: i32) -> (i32, i32) {
    %c0_i32 = arith.constant 0 : i32
    %c0_i32_0 = arith.constant 0 : i32
    %c0_i32_1 = arith.constant 0 : i32
    return %c0_i32, %c0_i32_0 : i32, i32
  }
  func.func @transform_3(%arg0: i32, %arg1: i32) -> (i32, i32) {
    %c0_i32 = arith.constant 0 : i32
    %c0_i32_0 = arith.constant 0 : i32
    return %arg0, %c0_i32 : i32, i32
  }
  func.func @transform_4(%arg0: i32, %arg1: i32) -> (i32, i32) {
    %c0_i32 = arith.constant 0 : i32
    %c0_i32_0 = arith.constant 0 : i32
    %c0_i32_1 = arith.constant 0 : i32
    return %c0_i32, %c0_i32_0 : i32, i32
  }
  func.func @transform_5(%arg0: i32, %arg1: i32) -> (i32, i32) {
    %c0_i32 = arith.constant 0 : i32
    %c0_i32_0 = arith.constant 0 : i32
    %c0_i32_1 = arith.constant 0 : i32
    return %c0_i32, %c0_i32_0 : i32, i32
  }
  func.func @transform_6(%arg0: i32, %arg1: i32) -> (i32, i32) {
    %c0_i32 = arith.constant 0 : i32
    %c0_i32_0 = arith.constant 0 : i32
    return %arg0, %c0_i32 : i32, i32
  }
}

module attributes {stable_mosaic.version = 11 : i64} {
  func.func @_matmul_kernel(%arg0: i32, %arg1: i32, %arg2: i32, %arg3: memref<16x128xbf16, #tpu.memory_space<vmem>>, %arg4: memref<128x128xbf16, #tpu.memory_space<vmem>>, %arg5: memref<1x128xf32, #tpu.memory_space<vmem>>, %arg6: memref<16x128xbf16, #tpu.memory_space<vmem>>, %arg7: memref<16x128xf32, #tpu.memory_space<vmem>>) attributes {dimension_semantics = [#tpu.dimension_semantics<parallel>, #tpu.dimension_semantics<parallel>, #tpu.dimension_semantics<arbitrary>], iteration_bounds = array<i64: 1, 1, 1>, scalar_prefetch = 0 : i64, scratch_operands = 1 : i64, tpu.core_type = #tpu.core_type<tc>, window_params = [{transform_indices = @transform_0, window_bounds = array<i64: 16, 128>}, {transform_indices = @transform_1, window_bounds = array<i64: 128, 128>}, {transform_indices = @transform_2, window_bounds = array<i64: 1, 128>}, {transform_indices = @transform_3, window_bounds = array<i64: 16, 128>}]} {
    %c0_i32 = arith.constant 0 : i32
    %0 = arith.cmpi eq, %arg2, %c0_i32 : i32
    %1 = arith.extui %0 : i1 to i32
    %c0_i32_0 = arith.constant 0 : i32
    %2 = arith.cmpi ne, %1, %c0_i32_0 : i32
    scf.if %2 {
      %cst_10 = arith.constant 0.000000e+00 : f32
      %12 = vector.broadcast %cst_10 : f32 to vector<16x128xf32>
      %c0_11 = arith.constant 0 : index
      %c0_12 = arith.constant 0 : index
      %13 = vector.load %arg7[%c0_11, %c0_12] : memref<16x128xf32, #tpu.memory_space<vmem>>, vector<16x128xf32>
      tpu.vector_store %arg7[%c0_11, %c0_12], %12 {strides = array<i32>} : memref<16x128xf32, #tpu.memory_space<vmem>>, vector<16x128xf32>,
    } else {
    }
    %c0 = arith.constant 0 : index
    %c0_1 = arith.constant 0 : index
    %3 = vector.load %arg7[%c0, %c0_1] : memref<16x128xf32, #tpu.memory_space<vmem>>, vector<16x128xf32>
    %c0_2 = arith.constant 0 : index
    %c0_3 = arith.constant 0 : index
    %4 = vector.load %arg3[%c0_2, %c0_3] : memref<16x128xbf16, #tpu.memory_space<vmem>>, vector<16x128xbf16>
    %c0_4 = arith.constant 0 : index
    %c0_5 = arith.constant 0 : index
    %5 = vector.load %arg4[%c0_4, %c0_5] : memref<128x128xbf16, #tpu.memory_space<vmem>>, vector<128x128xbf16>
    %cst = arith.constant dense<0.000000e+00> : vector<16x128xf32>
    %6 = tpu.matmul %4, %5, %cst {dimension_numbers = #tpu.dot_dimension_numbers<[1], [0], [0], [1], [0, 0, 1, 1], [], []>} : vector<16x128xbf16>, vector<128x128xbf16>, vector<16x128xf32> -> vector<16x128xf32>
    %7 = arith.addf %3, %6 : vector<16x128xf32>
    %c0_6 = arith.constant 0 : index
    %c0_7 = arith.constant 0 : index
    %8 = vector.load %arg7[%c0_6, %c0_7] : memref<16x128xf32, #tpu.memory_space<vmem>>, vector<16x128xf32>
    tpu.vector_store %arg7[%c0_6, %c0_7], %7 {strides = array<i32>} : memref<16x128xf32, #tpu.memory_space<vmem>>, vector<16x128xf32>,
    %c0_i32_8 = arith.constant 0 : i32
    %9 = arith.cmpi eq, %arg2, %c0_i32_8 : i32
    %10 = arith.extui %9 : i1 to i32
    %c0_i32_9 = arith.constant 0 : i32
    %11 = arith.cmpi ne, %10, %c0_i32_9 : i32
    scf.if %11 {
      %c0_10 = arith.constant 0 : index
      %c0_11 = arith.constant 0 : index
      %12 = vector.load %arg7[%c0_10, %c0_11] : memref<16x128xf32, #tpu.memory_space<vmem>>, vector<16x128xf32>
      %c0_12 = arith.constant 0 : index
      %c0_13 = arith.constant 0 : index
      %13 = vector.load %arg5[%c0_12, %c0_13] : memref<1x128xf32, #tpu.memory_space<vmem>>, vector<1x128xf32>
      %14 = vector.broadcast %13 : vector<1x128xf32> to vector<16x128xf32>
      %15 = arith.addf %12, %14 : vector<16x128xf32>
      %16 = arith.truncf %15 : vector<16x128xf32> to vector<16x128xbf16>
      %c0_14 = arith.constant 0 : index
      %c0_15 = arith.constant 0 : index
      %17 = vector.load %arg6[%c0_14, %c0_15] : memref<16x128xbf16, #tpu.memory_space<vmem>>, vector<16x128xbf16>
      tpu.vector_store %arg6[%c0_14, %c0_15], %16 {strides = array<i32>} : memref<16x128xbf16, #tpu.memory_space<vmem>>, vector<16x128xbf16>,
    } else {
    }
    return
  }
  func.func @transform_0(%arg0: i32, %arg1: i32, %arg2: i32) -> (i32, i32) {
    %c0_i32 = arith.constant 0 : i32
    return %arg0, %arg2 : i32, i32
  }
  func.func @transform_1(%arg0: i32, %arg1: i32, %arg2: i32) -> (i32, i32) {
    %c0_i32 = arith.constant 0 : i32
    return %arg2, %arg1 : i32, i32
  }
  func.func @transform_2(%arg0: i32, %arg1: i32, %arg2: i32) -> (i32, i32) {
    %c0_i32 = arith.constant 0 : i32
    %c0_i32_0 = arith.constant 0 : i32
    return %c0_i32, %arg1 : i32, i32
  }
  func.func @transform_3(%arg0: i32, %arg1: i32, %arg2: i32) -> (i32, i32) {
    %c0_i32 = arith.constant 0 : i32
    return %arg0, %arg1 : i32, i32
  }
}

module attributes {stable_mosaic.version = 11 : i64} {
  func.func @_mha_kernel(%arg0: i32, %arg1: i32, %arg2: memref<1x8x128xbf16, #tpu.memory_space<vmem>>, %arg3: memref<1x8x128xbf16, #tpu.memory_space<vmem>>, %arg4: memref<1x8x128xbf16, #tpu.memory_space<vmem>>, %arg5: memref<1x8x128xbf16, #tpu.memory_space<vmem>>) attributes {dimension_semantics = [#tpu.dimension_semantics<parallel>, #tpu.dimension_semantics<parallel>], iteration_bounds = array<i64: 2, 1>, scalar_prefetch = 0 : i64, scratch_operands = 0 : i64, tpu.core_type = #tpu.core_type<tc>, window_params = [{transform_indices = @transform_0, window_bounds = array<i64: 1, 8, 128>}, {transform_indices = @transform_1, window_bounds = array<i64: 1, 8, 128>}, {transform_indices = @transform_2, window_bounds = array<i64: 1, 8, 128>}, {transform_indices = @transform_3, window_bounds = array<i64: 1, 8, 128>}]} {
    %c0 = arith.constant 0 : index
    %c0_0 = arith.constant 0 : index
    %c0_1 = arith.constant 0 : index
    %0 = vector.load %arg2[%c0, %c0_0, %c0_1] : memref<1x8x128xbf16, #tpu.memory_space<vmem>>, vector<1x8x128xbf16>
    %1 = vector.shape_cast %0 : vector<1x8x128xbf16> to vector<8x128xbf16>
    %c0_2 = arith.constant 0 : index
    %c0_3 = arith.constant 0 : index
    %c0_4 = arith.constant 0 : index
    %2 = vector.load %arg3[%c0_2, %c0_3, %c0_4] : memref<1x8x128xbf16, #tpu.memory_space<vmem>>, vector<1x8x128xbf16>
    %3 = vector.shape_cast %2 : vector<1x8x128xbf16> to vector<8x128xbf16>
    %c0_5 = arith.constant 0 : index
    %c0_6 = arith.constant 0 : index
    %c0_7 = arith.constant 0 : index
    %4 = vector.load %arg4[%c0_5, %c0_6, %c0_7] : memref<1x8x128xbf16, #tpu.memory_space<vmem>>, vector<1x8x128xbf16>
    %5 = vector.shape_cast %4 : vector<1x8x128xbf16> to vector<8x128xbf16>
    %6 = vector.extract_strided_slice %1 {offsets = [0, 0], sizes = [8, 32], strides = [1, 1]} : vector<8x128xbf16> to vector<8x32xbf16>
    %7 = vector.extract_strided_slice %3 {offsets = [0, 0], sizes = [8, 32], strides = [1, 1]} : vector<8x128xbf16> to vector<8x32xbf16>
    %8 = vector.extract_strided_slice %5 {offsets = [0, 0], sizes = [8, 32], strides = [1, 1]} : vector<8x128xbf16> to vector<8x32xbf16>
    %cst = arith.constant dense<0.000000e+00> : vector<8x8xf32>
    %9 = tpu.matmul %6, %7, %cst {dimension_numbers = #tpu.dot_dimension_numbers<[1], [1], [0], [0], [0, 0, 1, 0], [], []>} : vector<8x32xbf16>, vector<8x32xbf16>, vector<8x8xf32> -> vector<8x8xf32>
    %cst_8 = arith.constant dense<0xFF800000> : vector<8xf32>
    %10 = vector.multi_reduction <maximumf>, %9, %cst_8 [1] : vector<8x8xf32> to vector<8xf32>
    %11 = vector.shape_cast %10 : vector<8xf32> to vector<8x1xf32>
    %12 = vector.broadcast %11 : vector<8x1xf32> to vector<8x8xf32>
    %13 = arith.subf %9, %12 : vector<8x8xf32>
    %14 = math.exp %13 : vector<8x8xf32>
    %cst_9 = arith.constant dense<0.000000e+00> : vector<8xf32>
    %15 = vector.multi_reduction <add>, %14, %cst_9 [1] : vector<8x8xf32> to vector<8xf32>
    %16 = vector.shape_cast %15 : vector<8xf32> to vector<8x1xf32>
    %cst_10 = arith.constant 1.000000e+00 : f32
    %17 = vector.broadcast %cst_10 : f32 to vector<8x1xf32>
    %18 = arith.divf %17, %16 : vector<8x1xf32>
    %19 = vector.broadcast %18 : vector<8x1xf32> to vector<8x8xf32>
    %20 = arith.mulf %14, %19 : vector<8x8xf32>
    %21 = arith.truncf %20 : vector<8x8xf32> to vector<8x8xbf16>
    %cst_11 = arith.constant dense<0.000000e+00> : vector<8x32xf32>
    %22 = tpu.matmul %21, %8, %cst_11 {dimension_numbers = #tpu.dot_dimension_numbers<[1], [0], [0], [1], [0, 0, 1, 1], [], []>} : vector<8x8xbf16>, vector<8x32xbf16>, vector<8x32xf32> -> vector<8x32xf32>
    %23 = vector.extract_strided_slice %1 {offsets = [0, 32], sizes = [8, 32], strides = [1, 1]} : vector<8x128xbf16> to vector<8x32xbf16>
    %24 = vector.extract_strided_slice %3 {offsets = [0, 32], sizes = [8, 32], strides = [1, 1]} : vector<8x128xbf16> to vector<8x32xbf16>
    %25 = vector.extract_strided_slice %5 {offsets = [0, 32], sizes = [8, 32], strides = [1, 1]} : vector<8x128xbf16> to vector<8x32xbf16>
    %cst_12 = arith.constant dense<0.000000e+00> : vector<8x8xf32>
    %26 = tpu.matmul %23, %24, %cst_12 {dimension_numbers = #tpu.dot_dimension_numbers<[1], [1], [0], [0], [0, 0, 1, 0], [], []>} : vector<8x32xbf16>, vector<8x32xbf16>, vector<8x8xf32> -> vector<8x8xf32>
    %cst_13 = arith.constant dense<0xFF800000> : vector<8xf32>
    %27 = vector.multi_reduction <maximumf>, %26, %cst_13 [1] : vector<8x8xf32> to vector<8xf32>
    %28 = vector.shape_cast %27 : vector<8xf32> to vector<8x1xf32>
    %29 = vector.broadcast %28 : vector<8x1xf32> to vector<8x8xf32>
    %30 = arith.subf %26, %29 : vector<8x8xf32>
    %31 = math.exp %30 : vector<8x8xf32>
    %cst_14 = arith.constant dense<0.000000e+00> : vector<8xf32>
    %32 = vector.multi_reduction <add>, %31, %cst_14 [1] : vector<8x8xf32> to vector<8xf32>
    %33 = vector.shape_cast %32 : vector<8xf32> to vector<8x1xf32>
    %cst_15 = arith.constant 1.000000e+00 : f32
    %34 = vector.broadcast %cst_15 : f32 to vector<8x1xf32>
    %35 = arith.divf %34, %33 : vector<8x1xf32>
    %36 = vector.broadcast %35 : vector<8x1xf32> to vector<8x8xf32>
    %37 = arith.mulf %31, %36 : vector<8x8xf32>
    %38 = arith.truncf %37 : vector<8x8xf32> to vector<8x8xbf16>
    %cst_16 = arith.constant dense<0.000000e+00> : vector<8x32xf32>
    %39 = tpu.matmul %38, %25, %cst_16 {dimension_numbers = #tpu.dot_dimension_numbers<[1], [0], [0], [1], [0, 0, 1, 1], [], []>} : vector<8x8xbf16>, vector<8x32xbf16>, vector<8x32xf32> -> vector<8x32xf32>
    %40 = vector.extract_strided_slice %1 {offsets = [0, 64], sizes = [8, 32], strides = [1, 1]} : vector<8x128xbf16> to vector<8x32xbf16>
    %41 = vector.extract_strided_slice %3 {offsets = [0, 64], sizes = [8, 32], strides = [1, 1]} : vector<8x128xbf16> to vector<8x32xbf16>
    %42 = vector.extract_strided_slice %5 {offsets = [0, 64], sizes = [8, 32], strides = [1, 1]} : vector<8x128xbf16> to vector<8x32xbf16>
    %cst_17 = arith.constant dense<0.000000e+00> : vector<8x8xf32>
    %43 = tpu.matmul %40, %41, %cst_17 {dimension_numbers = #tpu.dot_dimension_numbers<[1], [1], [0], [0], [0, 0, 1, 0], [], []>} : vector<8x32xbf16>, vector<8x32xbf16>, vector<8x8xf32> -> vector<8x8xf32>
    %cst_18 = arith.constant dense<0xFF800000> : vector<8xf32>
    %44 = vector.multi_reduction <maximumf>, %43, %cst_18 [1] : vector<8x8xf32> to vector<8xf32>
    %45 = vector.shape_cast %44 : vector<8xf32> to vector<8x1xf32>
    %46 = vector.broadcast %45 : vector<8x1xf32> to vector<8x8xf32>
    %47 = arith.subf %43, %46 : vector<8x8xf32>
    %48 = math.exp %47 : vector<8x8xf32>
    %cst_19 = arith.constant dense<0.000000e+00> : vector<8xf32>
    %49 = vector.multi_reduction <add>, %48, %cst_19 [1] : vector<8x8xf32> to vector<8xf32>
    %50 = vector.shape_cast %49 : vector<8xf32> to vector<8x1xf32>
    %cst_20 = arith.constant 1.000000e+00 : f32
    %51 = vector.broadcast %cst_20 : f32 to vector<8x1xf32>
    %52 = arith.divf %51, %50 : vector<8x1xf32>
    %53 = vector.broadcast %52 : vector<8x1xf32> to vector<8x8xf32>
    %54 = arith.mulf %48, %53 : vector<8x8xf32>
    %55 = arith.truncf %54 : vector<8x8xf32> to vector<8x8xbf16>
    %cst_21 = arith.constant dense<0.000000e+00> : vector<8x32xf32>
    %56 = tpu.matmul %55, %42, %cst_21 {dimension_numbers = #tpu.dot_dimension_numbers<[1], [0], [0], [1], [0, 0, 1, 1], [], []>} : vector<8x8xbf16>, vector<8x32xbf16>, vector<8x32xf32> -> vector<8x32xf32>
    %57 = vector.extract_strided_slice %1 {offsets = [0, 96], sizes = [8, 32], strides = [1, 1]} : vector<8x128xbf16> to vector<8x32xbf16>
    %58 = vector.extract_strided_slice %3 {offsets = [0, 96], sizes = [8, 32], strides = [1, 1]} : vector<8x128xbf16> to vector<8x32xbf16>
    %59 = vector.extract_strided_slice %5 {offsets = [0, 96], sizes = [8, 32], strides = [1, 1]} : vector<8x128xbf16> to vector<8x32xbf16>
    %cst_22 = arith.constant dense<0.000000e+00> : vector<8x8xf32>
    %60 = tpu.matmul %57, %58, %cst_22 {dimension_numbers = #tpu.dot_dimension_numbers<[1], [1], [0], [0], [0, 0, 1, 0], [], []>} : vector<8x32xbf16>, vector<8x32xbf16>, vector<8x8xf32> -> vector<8x8xf32>
    %cst_23 = arith.constant dense<0xFF800000> : vector<8xf32>
    %61 = vector.multi_reduction <maximumf>, %60, %cst_23 [1] : vector<8x8xf32> to vector<8xf32>
    %62 = vector.shape_cast %61 : vector<8xf32> to vector<8x1xf32>
    %63 = vector.broadcast %62 : vector<8x1xf32> to vector<8x8xf32>
    %64 = arith.subf %60, %63 : vector<8x8xf32>
    %65 = math.exp %64 : vector<8x8xf32>
    %cst_24 = arith.constant dense<0.000000e+00> : vector<8xf32>
    %66 = vector.multi_reduction <add>, %65, %cst_24 [1] : vector<8x8xf32> to vector<8xf32>
    %67 = vector.shape_cast %66 : vector<8xf32> to vector<8x1xf32>
    %cst_25 = arith.constant 1.000000e+00 : f32
    %68 = vector.broadcast %cst_25 : f32 to vector<8x1xf32>
    %69 = arith.divf %68, %67 : vector<8x1xf32>
    %70 = vector.broadcast %69 : vector<8x1xf32> to vector<8x8xf32>
    %71 = arith.mulf %65, %70 : vector<8x8xf32>
    %72 = arith.truncf %71 : vector<8x8xf32> to vector<8x8xbf16>
    %cst_26 = arith.constant dense<0.000000e+00> : vector<8x32xf32>
    %73 = tpu.matmul %72, %59, %cst_26 {dimension_numbers = #tpu.dot_dimension_numbers<[1], [0], [0], [1], [0, 0, 1, 1], [], []>} : vector<8x8xbf16>, vector<8x32xbf16>, vector<8x32xf32> -> vector<8x32xf32>
    %74 = tpu.concatenate %22, %39, %56, %73 in 1 : vector<8x32xf32>, vector<8x32xf32>, vector<8x32xf32>, vector<8x32xf32> -> vector<8x128xf32>
    %75 = arith.truncf %74 : vector<8x128xf32> to vector<8x128xbf16>
    %c0_27 = arith.constant 0 : index
    %c0_28 = arith.constant 0 : index
    %c0_29 = arith.constant 0 : index
    %76 = vector.load %arg5[%c0_27, %c0_28, %c0_29] : memref<1x8x128xbf16, #tpu.memory_space<vmem>>, vector<1x8x128xbf16>
    %77 = vector.shape_cast %76 : vector<1x8x128xbf16> to vector<8x128xbf16>
    %78 = vector.shape_cast %75 : vector<8x128xbf16> to vector<1x8x128xbf16>
    tpu.vector_store %arg5[%c0_27, %c0_28, %c0_29], %78 {strides = array<i32>} : memref<1x8x128xbf16, #tpu.memory_space<vmem>>, vector<1x8x128xbf16>,
    return
  }
  func.func @transform_0(%arg0: i32, %arg1: i32) -> (i32, i32, i32) {
    %c0_i32 = arith.constant 0 : i32
    %0 = arith.addi %c0_i32, %arg1 : i32
    %c0_i32_0 = arith.constant 0 : i32
    %c0_i32_1 = arith.constant 0 : i32
    return %arg0, %c0_i32_0, %0 : i32, i32, i32
  }
  func.func @transform_1(%arg0: i32, %arg1: i32) -> (i32, i32, i32) {
    %c0_i32 = arith.constant 0 : i32
    %0 = arith.addi %c0_i32, %arg1 : i32
    %c0_i32_0 = arith.constant 0 : i32
    %c0_i32_1 = arith.constant 0 : i32
    return %arg0, %c0_i32_0, %0 : i32, i32, i32
  }
  func.func @transform_2(%arg0: i32, %arg1: i32) -> (i32, i32, i32) {
    %c1_i32 = arith.constant 1 : i32
    %0 = arith.addi %c1_i32, %arg1 : i32
    %c0_i32 = arith.constant 0 : i32
    %c0_i32_0 = arith.constant 0 : i32
    return %arg0, %c0_i32, %0 : i32, i32, i32
  }
  func.func @transform_3(%arg0: i32, %arg1: i32) -> (i32, i32, i32) {
    %c0_i32 = arith.constant 0 : i32
    %c0_i32_0 = arith.constant 0 : i32
    return %arg0, %c0_i32, %arg1 : i32, i32, i32
  }
}

module attributes {stable_mosaic.version = 11 : i64} {
  func.func @_matmul_kernel(%arg0: i32, %arg1: i32, %arg2: i32, %arg3: memref<16x128xbf16, #tpu.memory_space<vmem>>, %arg4: memref<128x256xbf16, #tpu.memory_space<vmem>>, %arg5: memref<1x256xf32, #tpu.memory_space<vmem>>, %arg6: memref<16x256xbf16, #tpu.memory_space<vmem>>, %arg7: memref<16x256xf32, #tpu.memory_space<vmem>>) attributes {dimension_semantics = [#tpu.dimension_semantics<parallel>, #tpu.dimension_semantics<parallel>, #tpu.dimension_semantics<arbitrary>], iteration_bounds = array<i64: 1, 1, 1>, scalar_prefetch = 0 : i64, scratch_operands = 1 : i64, tpu.core_type = #tpu.core_type<tc>, window_params = [{transform_indices = @transform_0, window_bounds = array<i64: 16, 128>}, {transform_indices = @transform_1, window_bounds = array<i64: 128, 256>}, {transform_indices = @transform_2, window_bounds = array<i64: 1, 256>}, {transform_indices = @transform_3, window_bounds = array<i64: 16, 256>}]} {
    %c0_i32 = arith.constant 0 : i32
    %0 = arith.cmpi eq, %arg2, %c0_i32 : i32
    %1 = arith.extui %0 : i1 to i32
    %c0_i32_0 = arith.constant 0 : i32
    %2 = arith.cmpi ne, %1, %c0_i32_0 : i32
    scf.if %2 {
      %cst_10 = arith.constant 0.000000e+00 : f32
      %12 = vector.broadcast %cst_10 : f32 to vector<16x256xf32>
      %c0_11 = arith.constant 0 : index
      %c0_12 = arith.constant 0 : index
      %13 = vector.load %arg7[%c0_11, %c0_12] : memref<16x256xf32, #tpu.memory_space<vmem>>, vector<16x256xf32>
      tpu.vector_store %arg7[%c0_11, %c0_12], %12 {strides = array<i32>} : memref<16x256xf32, #tpu.memory_space<vmem>>, vector<16x256xf32>,
    } else {
    }
    %c0 = arith.constant 0 : index
    %c0_1 = arith.constant 0 : index
    %3 = vector.load %arg7[%c0, %c0_1] : memref<16x256xf32, #tpu.memory_space<vmem>>, vector<16x256xf32>
    %c0_2 = arith.constant 0 : index
    %c0_3 = arith.constant 0 : index
    %4 = vector.load %arg3[%c0_2, %c0_3] : memref<16x128xbf16, #tpu.memory_space<vmem>>, vector<16x128xbf16>
    %c0_4 = arith.constant 0 : index
    %c0_5 = arith.constant 0 : index
    %5 = vector.load %arg4[%c0_4, %c0_5] : memref<128x256xbf16, #tpu.memory_space<vmem>>, vector<128x256xbf16>
    %cst = arith.constant dense<0.000000e+00> : vector<16x256xf32>
    %6 = tpu.matmul %4, %5, %cst {dimension_numbers = #tpu.dot_dimension_numbers<[1], [0], [0], [1], [0, 0, 1, 1], [], []>} : vector<16x128xbf16>, vector<128x256xbf16>, vector<16x256xf32> -> vector<16x256xf32>
    %7 = arith.addf %3, %6 : vector<16x256xf32>
    %c0_6 = arith.constant 0 : index
    %c0_7 = arith.constant 0 : index
    %8 = vector.load %arg7[%c0_6, %c0_7] : memref<16x256xf32, #tpu.memory_space<vmem>>, vector<16x256xf32>
    tpu.vector_store %arg7[%c0_6, %c0_7], %7 {strides = array<i32>} : memref<16x256xf32, #tpu.memory_space<vmem>>, vector<16x256xf32>,
    %c0_i32_8 = arith.constant 0 : i32
    %9 = arith.cmpi eq, %arg2, %c0_i32_8 : i32
    %10 = arith.extui %9 : i1 to i32
    %c0_i32_9 = arith.constant 0 : i32
    %11 = arith.cmpi ne, %10, %c0_i32_9 : i32
    scf.if %11 {
      %c0_10 = arith.constant 0 : index
      %c0_11 = arith.constant 0 : index
      %12 = vector.load %arg7[%c0_10, %c0_11] : memref<16x256xf32, #tpu.memory_space<vmem>>, vector<16x256xf32>
      %c0_12 = arith.constant 0 : index
      %c0_13 = arith.constant 0 : index
      %13 = vector.load %arg5[%c0_12, %c0_13] : memref<1x256xf32, #tpu.memory_space<vmem>>, vector<1x256xf32>
      %14 = vector.broadcast %13 : vector<1x256xf32> to vector<16x256xf32>
      %15 = arith.addf %12, %14 : vector<16x256xf32>
      %16 = arith.truncf %15 : vector<16x256xf32> to vector<16x256xbf16>
      %c0_14 = arith.constant 0 : index
      %c0_15 = arith.constant 0 : index
      %17 = vector.load %arg6[%c0_14, %c0_15] : memref<16x256xbf16, #tpu.memory_space<vmem>>, vector<16x256xbf16>
      tpu.vector_store %arg6[%c0_14, %c0_15], %16 {strides = array<i32>} : memref<16x256xbf16, #tpu.memory_space<vmem>>, vector<16x256xbf16>,
    } else {
    }
    return
  }
  func.func @transform_0(%arg0: i32, %arg1: i32, %arg2: i32) -> (i32, i32) {
    %c0_i32 = arith.constant 0 : i32
    return %arg0, %arg2 : i32, i32
  }
  func.func @transform_1(%arg0: i32, %arg1: i32, %arg2: i32) -> (i32, i32) {
    %c0_i32 = arith.constant 0 : i32
    return %arg2, %arg1 : i32, i32
  }
  func.func @transform_2(%arg0: i32, %arg1: i32, %arg2: i32) -> (i32, i32) {
    %c0_i32 = arith.constant 0 : i32
    %c0_i32_0 = arith.constant 0 : i32
    return %c0_i32, %arg1 : i32, i32
  }
  func.func @transform_3(%arg0: i32, %arg1: i32, %arg2: i32) -> (i32, i32) {
    %c0_i32 = arith.constant 0 : i32
    return %arg0, %arg1 : i32, i32
  }
}

module attributes {stable_mosaic.version = 11 : i64} {
  func.func @_ffn_res_ln_kernel(%arg0: i32, %arg1: i32, %arg2: memref<16x128xbf16, #tpu.memory_space<vmem>>, %arg3: memref<128x256xbf16, #tpu.memory_space<vmem>>, %arg4: memref<1x256xf32, #tpu.memory_space<vmem>>, %arg5: memref<256x128xbf16, #tpu.memory_space<vmem>>, %arg6: memref<1x128xf32, #tpu.memory_space<vmem>>, %arg7: memref<16x128xbf16, #tpu.memory_space<vmem>>, %arg8: memref<1x128xf32, #tpu.memory_space<vmem>>, %arg9: memref<1x128xf32, #tpu.memory_space<vmem>>, %arg10: memref<16x128xbf16, #tpu.memory_space<vmem>>, %arg11: memref<16x128xf32, #tpu.memory_space<vmem>>) attributes {dimension_semantics = [#tpu.dimension_semantics<parallel>, #tpu.dimension_semantics<arbitrary>], iteration_bounds = array<i64: 1, 1>, scalar_prefetch = 0 : i64, scratch_operands = 1 : i64, tpu.core_type = #tpu.core_type<tc>, window_params = [{transform_indices = @transform_0, window_bounds = array<i64: 16, 128>}, {transform_indices = @transform_1, window_bounds = array<i64: 128, 256>}, {transform_indices = @transform_2, window_bounds = array<i64: 1, 256>}, {transform_indices = @transform_3, window_bounds = array<i64: 256, 128>}, {pipeline_mode = #tpu.pipeline_mode<synchronous>, transform_indices = @transform_4, window_bounds = array<i64: 1, 128>}, {transform_indices = @transform_5, window_bounds = array<i64: 16, 128>}, {pipeline_mode = #tpu.pipeline_mode<synchronous>, transform_indices = @transform_6, window_bounds = array<i64: 1, 128>}, {pipeline_mode = #tpu.pipeline_mode<synchronous>, transform_indices = @transform_7, window_bounds = array<i64: 1, 128>}, {transform_indices = @transform_8, window_bounds = array<i64: 16, 128>}]} {
    %c0_i32 = arith.constant 0 : i32
    %0 = arith.cmpi eq, %arg1, %c0_i32 : i32
    %1 = arith.extui %0 : i1 to i32
    %c0_i32_0 = arith.constant 0 : i32
    %2 = arith.cmpi ne, %1, %c0_i32_0 : i32
    scf.if %2 {
      %cst_16 = arith.constant 0.000000e+00 : f32
      %20 = vector.broadcast %cst_16 : f32 to vector<16x128xf32>
      %c0_17 = arith.constant 0 : index
      %c0_18 = arith.constant 0 : index
      %21 = vector.load %arg11[%c0_17, %c0_18] : memref<16x128xf32, #tpu.memory_space<vmem>>, vector<16x128xf32>
      tpu.vector_store %arg11[%c0_17, %c0_18], %20 {strides = array<i32>} : memref<16x128xf32, #tpu.memory_space<vmem>>, vector<16x128xf32>,
    } else {
    }
    %c0 = arith.constant 0 : index
    %c0_1 = arith.constant 0 : index
    %3 = vector.load %arg2[%c0, %c0_1] : memref<16x128xbf16, #tpu.memory_space<vmem>>, vector<16x128xbf16>
    %c0_2 = arith.constant 0 : index
    %c0_3 = arith.constant 0 : index
    %4 = vector.load %arg3[%c0_2, %c0_3] : memref<128x256xbf16, #tpu.memory_space<vmem>>, vector<128x256xbf16>
    %cst = arith.constant dense<0.000000e+00> : vector<16x256xf32>
    %5 = tpu.matmul %3, %4, %cst {dimension_numbers = #tpu.dot_dimension_numbers<[1], [0], [0], [1], [0, 0, 1, 1], [], []>} : vector<16x128xbf16>, vector<128x256xbf16>, vector<16x256xf32> -> vector<16x256xf32>
    %c0_4 = arith.constant 0 : index
    %c0_5 = arith.constant 0 : index
    %6 = vector.load %arg4[%c0_4, %c0_5] : memref<1x256xf32, #tpu.memory_space<vmem>>, vector<1x256xf32>
    %7 = vector.broadcast %6 : vector<1x256xf32> to vector<16x256xf32>
    %8 = arith.addf %5, %7 : vector<16x256xf32>
    %cst_6 = arith.constant 0.000000e+00 : f32
    %9 = vector.broadcast %cst_6 : f32 to vector<16x256xf32>
    %10 = arith.maximumf %8, %9 : vector<16x256xf32>
    %c0_7 = arith.constant 0 : index
    %c0_8 = arith.constant 0 : index
    %11 = vector.load %arg11[%c0_7, %c0_8] : memref<16x128xf32, #tpu.memory_space<vmem>>, vector<16x128xf32>
    %12 = arith.truncf %10 : vector<16x256xf32> to vector<16x256xbf16>
    %c0_9 = arith.constant 0 : index
    %c0_10 = arith.constant 0 : index
    %13 = vector.load %arg5[%c0_9, %c0_10] : memref<256x128xbf16, #tpu.memory_space<vmem>>, vector<256x128xbf16>
    %cst_11 = arith.constant dense<0.000000e+00> : vector<16x128xf32>
    %14 = tpu.matmul %12, %13, %cst_11 {dimension_numbers = #tpu.dot_dimension_numbers<[1], [0], [0], [1], [0, 0, 1, 1], [], []>} : vector<16x256xbf16>, vector<256x128xbf16>, vector<16x128xf32> -> vector<16x128xf32>
    %15 = arith.addf %11, %14 : vector<16x128xf32>
    %c0_12 = arith.constant 0 : index
    %c0_13 = arith.constant 0 : index
    %16 = vector.load %arg11[%c0_12, %c0_13] : memref<16x128xf32, #tpu.memory_space<vmem>>, vector<16x128xf32>
    tpu.vector_store %arg11[%c0_12, %c0_13], %15 {strides = array<i32>} : memref<16x128xf32, #tpu.memory_space<vmem>>, vector<16x128xf32>,
    %c0_i32_14 = arith.constant 0 : i32
    %17 = arith.cmpi eq, %arg1, %c0_i32_14 : i32
    %18 = arith.extui %17 : i1 to i32
    %c0_i32_15 = arith.constant 0 : i32
    %19 = arith.cmpi ne, %18, %c0_i32_15 : i32
    scf.if %19 {
      %c0_16 = arith.constant 0 : index
      %c0_17 = arith.constant 0 : index
      %20 = vector.load %arg11[%c0_16, %c0_17] : memref<16x128xf32, #tpu.memory_space<vmem>>, vector<16x128xf32>
      %c0_18 = arith.constant 0 : index
      %c0_19 = arith.constant 0 : index
      %21 = vector.load %arg6[%c0_18, %c0_19] : memref<1x128xf32, #tpu.memory_space<vmem>>, vector<1x128xf32>
      %22 = vector.broadcast %21 : vector<1x128xf32> to vector<16x128xf32>
      %23 = arith.addf %20, %22 : vector<16x128xf32>
      %c0_20 = arith.constant 0 : index
      %c0_21 = arith.constant 0 : index
      %24 = vector.load %arg7[%c0_20, %c0_21] : memref<16x128xbf16, #tpu.memory_space<vmem>>, vector<16x128xbf16>
      %25 = arith.extf %24 : vector<16x128xbf16> to vector<16x128xf32>
      %26 = arith.addf %23, %25 : vector<16x128xf32>
      %c0_22 = arith.constant 0 : index
      %c0_23 = arith.constant 0 : index
      %27 = vector.load %arg8[%c0_22, %c0_23] : memref<1x128xf32, #tpu.memory_space<vmem>>, vector<1x128xf32>
      %c0_24 = arith.constant 0 : index
      %c0_25 = arith.constant 0 : index
      %28 = vector.load %arg9[%c0_24, %c0_25] : memref<1x128xf32, #tpu.memory_space<vmem>>, vector<1x128xf32>
      %cst_26 = arith.constant dense<0.000000e+00> : vector<16xf32>
      %29 = vector.multi_reduction <add>, %26, %cst_26 [1] : vector<16x128xf32> to vector<16xf32>
      %30 = vector.shape_cast %29 : vector<16xf32> to vector<16x1xf32>
      %31 = arith.mulf %26, %26 : vector<16x128xf32>
      %cst_27 = arith.constant dense<0.000000e+00> : vector<16xf32>
      %32 = vector.multi_reduction <add>, %31, %cst_27 [1] : vector<16x128xf32> to vector<16xf32>
      %33 = vector.shape_cast %32 : vector<16xf32> to vector<16x1xf32>
      %cst_28 = arith.constant 7.812500e-03 : f32
      %34 = vector.broadcast %cst_28 : f32 to vector<16x1xf32>
      %35 = arith.mulf %30, %34 : vector<16x1xf32>
      %cst_29 = arith.constant 7.812500e-03 : f32
      %36 = vector.broadcast %cst_29 : f32 to vector<16x1xf32>
      %37 = arith.mulf %33, %36 : vector<16x1xf32>
      %38 = arith.mulf %35, %35 : vector<16x1xf32>
      %39 = arith.subf %37, %38 : vector<16x1xf32>
      %40 = vector.broadcast %35 : vector<16x1xf32> to vector<16x128xf32>
      %41 = arith.subf %26, %40 : vector<16x128xf32>
      %cst_30 = arith.constant 9.99999974E-6 : f32
      %42 = vector.broadcast %cst_30 : f32 to vector<16x1xf32>
      %43 = arith.addf %39, %42 : vector<16x1xf32>
      %44 = math.rsqrt %43 : vector<16x1xf32>
      %45 = vector.broadcast %44 : vector<16x1xf32> to vector<16x128xf32>
      %46 = arith.mulf %41, %45 : vector<16x128xf32>
      %47 = vector.broadcast %27 : vector<1x128xf32> to vector<16x128xf32>
      %48 = arith.mulf %46, %47 : vector<16x128xf32>
      %49 = vector.broadcast %28 : vector<1x128xf32> to vector<16x128xf32>
      %50 = arith.addf %48, %49 : vector<16x128xf32>
      %51 = arith.truncf %50 : vector<16x128xf32> to vector<16x128xbf16>
      %c0_31 = arith.constant 0 : index
      %c0_32 = arith.constant 0 : index
      %52 = vector.load %arg10[%c0_31, %c0_32] : memref<16x128xbf16, #tpu.memory_space<vmem>>, vector<16x128xbf16>
      tpu.vector_store %arg10[%c0_31, %c0_32], %51 {strides = array<i32>} : memref<16x128xbf16, #tpu.memory_space<vmem>>, vector<16x128xbf16>,
    } else {
    }
    return
  }
  func.func @transform_0(%arg0: i32, %arg1: i32) -> (i32, i32) {
    %c0_i32 = arith.constant 0 : i32
    %c0_i32_0 = arith.constant 0 : i32
    return %arg0, %c0_i32 : i32, i32
  }
  func.func @transform_1(%arg0: i32, %arg1: i32) -> (i32, i32) {
    %c0_i32 = arith.constant 0 : i32
    %c0_i32_0 = arith.constant 0 : i32
    return %c0_i32, %arg1 : i32, i32
  }
  func.func @transform_2(%arg0: i32, %arg1: i32) -> (i32, i32) {
    %c0_i32 = arith.constant 0 : i32
    %c0_i32_0 = arith.constant 0 : i32
    return %c0_i32, %arg1 : i32, i32
  }
  func.func @transform_3(%arg0: i32, %arg1: i32) -> (i32, i32) {
    %c0_i32 = arith.constant 0 : i32
    %c0_i32_0 = arith.constant 0 : i32
    return %arg1, %c0_i32 : i32, i32
  }
  func.func @transform_4(%arg0: i32, %arg1: i32) -> (i32, i32) {
    %c0_i32 = arith.constant 0 : i32
    %c0_i32_0 = arith.constant 0 : i32
    %c0_i32_1 = arith.constant 0 : i32
    return %c0_i32, %c0_i32_0 : i32, i32
  }
  func.func @transform_5(%arg0: i32, %arg1: i32) -> (i32, i32) {
    %c0_i32 = arith.constant 0 : i32
    %c0_i32_0 = arith.constant 0 : i32
    return %arg0, %c0_i32 : i32, i32
  }
  func.func @transform_6(%arg0: i32, %arg1: i32) -> (i32, i32) {
    %c0_i32 = arith.constant 0 : i32
    %c0_i32_0 = arith.constant 0 : i32
    %c0_i32_1 = arith.constant 0 : i32
    return %c0_i32, %c0_i32_0 : i32, i32
  }
  func.func @transform_7(%arg0: i32, %arg1: i32) -> (i32, i32) {
    %c0_i32 = arith.constant 0 : i32
    %c0_i32_0 = arith.constant 0 : i32
    %c0_i32_1 = arith.constant 0 : i32
    return %c0_i32, %c0_i32_0 : i32, i32
  }
  func.func @transform_8(%arg0: i32, %arg1: i32) -> (i32, i32) {
    %c0_i32 = arith.constant 0 : i32
    %c0_i32_0 = arith.constant 0 : i32
    return %arg0, %c0_i32 : i32, i32
  }
}

</mosaic_0001>

<bundles_post_ra>
// kernel: srp_decoder_layer_forward.10
= control target key start
LH: loop header
LB: loop body
LE: loop exit
PB: predicated region body
PF: predicated region fallthrough
CT: control target
= control target key end

     0   :  { %11 = vsyncpa [#allocation4], 0  ;;  %s309_s24 = smov [#allocation3]   ;;  %s310_s26 = smov 64   ;;  %s368_s0 = inlined_call_operand.vmem [shape: bf16[16,128], index: 0, kind: input, shape index: {}]   ;;  %s369_s1 = inlined_call_operand.hbm [shape: bf16[128,128], index: 1, kind: input, shape index: {}]   ;;  %s370_s2 = inlined_call_operand.vmem [shape: f32[1,128], index: 2, kind: input, shape index: {}]   ;;  %s371_s3 = inlined_call_operand.vmem [shape: bf16[16,128], index: 3, kind: input, shape index: {}]   ;;  %s372_s4 = inlined_call_operand.vmem [shape: f32[1,128], index: 4, kind: input, shape index: {}]   ;;  %s373_s5 = inlined_call_operand.vmem [shape: f32[1,128], index: 5, kind: input, shape index: {}]   ;;  %s374_s6 = inlined_call_operand.vmem [shape: bf16[16,128], index: 6, kind: output, shape index: {}]  }
   0x1   :  { %s18_s23 = sshll.u32 %s369_s1, 4  ;;  %s20_s25 = sshll.u32 %s309_s24, 4  ;;  %s19_s23 = int_to_ptr.hbm [resolvable:$true] %s18_s23  ;;  %s21_s25 = int_to_ptr.vmem [resolvable:$true] %s20_s25 }
   0x2   :  { %s311_s27 = smov 4  }
   0x3   :  { %26 = dma.hbm_to_vmem [thread:$0]  %s19_s23, 1024, %s21_s25, [#allocation4], %s310_s26, %s310_s26, %s311_s27  }
   0x4   :  { %307 = dma.done.wait [#allocation4], 1024  }
   0x5   :  { %308 = vsyncadd [#allocation4], 4294966272  ;;  %v263_v0 = vld [vmem:[#allocation3 + $0x38] sm:$0xff]  ;;  %v262_v1 = vld [vmem:[#allocation3 + $0x30] sm:$0xff] }
   0x6   :  { %119 = vmatpush.bf16.msra.mxu0 %v263_v0  ;;  %v261_v2 = vld [vmem:[#allocation3 + $0x28] sm:$0xff]  ;;  %v260_v3 = vld [vmem:[#allocation3 + $0x20] sm:$0xff]  ;;  %v259_v4 = vld [vmem:[#allocation3 + $0x18] sm:$0xff] }
   0x7   :  { %v258_v5 = vld [vmem:[#allocation3 + $0x10] sm:$0xff]  ;;  %v257_v6 = vld [vmem:[#allocation3 + $0x8] sm:$0xff]  ;;  %v256_v7 = vld [vmem:[#allocation3] sm:$0xff] }
   0x8   :  { %v255_v8 = vld [vmem:[%s368_s0] sm:$0xff] }
   0x9   :  { %v265_v9 = vld [vmem:[%s371_s3] sm:$0xff]  }
   0xa   :  { %120 = vmatpush.bf16.msra.mxu0 %v262_v1  ;;  %v276_v10 = vld [vmem:[%s370_s2] ss:$0 sm:$0xff]  ;;  %v266_v11 = vunpack.c.l.bf16 %v265_v9  ;;  %v267_v16 = vunpack.c.h.bf16 %v265_v9 }
   0xb   :  { %v277_v48 = vld [vmem:[%s372_s4] ss:$0 sm:$0xff] }
   0xc   :  { %v278_v53 = vld [vmem:[%s373_s5] ss:$0 sm:$0xff] }
   0xe   :  { %121 = vmatpush.bf16.msra.mxu0 %v261_v2 }
  0x12   :  { %122 = vmatpush.bf16.msra.mxu0 %v260_v3 }
  0x16   :  { %123 = vmatpush.bf16.msra.mxu0 %v259_v4 }
  0x1a   :  { %124 = vmatpush.bf16.msra.mxu0 %v258_v5 }
  0x1e   :  { %125 = vmatpush.bf16.msra.mxu0 %v257_v6 }
  0x22   :  { %126 = vmatpush.bf16.msra.mxu0 %v256_v7 }
  0x25   :  { %127 = vmatmul.bf16.vlgmr.msra.gmra.mxu0 %v255_v8 }
  0xa2   :  { %v128_v12 = vpop.f32.mrf.mxu0 }
  0xa3   :  { %v146_v13 = vadd.f32 %v276_v10, %v128_v12 }
  0xa5   :  { %v152_v14 = vadd.f32 %v266_v11, %v146_v13 }
  0xa7   :  { %156 = vadd.xlane.f32.xlu0 %v152_v14  ;;  %v160_v15 = vmul.f32 %v152_v14, %v152_v14 }
  0xa9   :  { %162 = vadd.xlane.f32.xlu1 %v160_v15 }
  0xaa   :  { %v130_v17 = vpop.f32.mrf.mxu0 }
  0xab   :  { %v147_v18 = vadd.f32 %v276_v10, %v130_v17 }
  0xad   :  { %v153_v19 = vadd.f32 %v267_v16, %v147_v18 }
  0xaf   :  { %158 = vadd.xlane.f32.xlu0 %v153_v19  ;;  %v161_v20 = vmul.f32 %v153_v19, %v153_v19 }
  0xb1   :  { %164 = vadd.xlane.f32.xlu1 %v161_v20 }
 0x11a   :  { %v157_v21 = vpop.xlane.xlu0 %156 }
 0x11b   :  { %v166_v22 = vmul.f32 0.0078125, %v157_v21 }
 0x11c   :  { %v163_v23 = vpop.xlane.xlu1 %162 }
 0x11d   :  { %v170_v24 = vmul.f32 %v166_v22, %v166_v22  ;;  %v168_v25 = vmul.f32 0.0078125, %v163_v23  ;;  %v174_v46 = vsub.f32 %v152_v14, %v166_v22 }
 0x11f   :  { %v172_v26 = vsub.f32 %v168_v25, %v170_v24 }
 0x121   :  { %v176_v27 = vadd.f32 1e-05, %v172_v26 }
 0x122   :  { %v159_v28 = vpop.xlane.xlu0 %158 }
 0x123   :  { %279 = vrsqrt.f32 %v176_v27  ;;  %v167_v29 = vmul.f32 0.0078125, %v159_v28  ;;  %vm184_vm1 = vweird.f32 %v176_v27 }
 0x124   :  { %v165_v30 = vpop.xlane.xlu1 %164 }
 0x125   :  { %v171_v31 = vmul.f32 %v167_v29, %v167_v29  ;;  %v169_v32 = vmul.f32 0.0078125, %v165_v30  ;;  %v175_v51 = vsub.f32 %v153_v19, %v167_v29 }
 0x127   :  { %v173_v33 = vsub.f32 %v169_v32, %v171_v31 }
 0x129   :  { %v280_v34 = vpop.eup %279  ;;  %v177_v35 = vadd.f32 1e-05, %v173_v33 }
 0x12a   :  { %v179_v36 = vmul.f32 %v280_v34, %v176_v27  ;;  %vm185_vm0 = vweird.f32 %v280_v34 }
 0x12b   :  { %281 = vrsqrt.f32 %v177_v35  ;;  %vm186_vm2 = vmor %vm184_vm1, %vm185_vm0  ;;  %vm194_vm4 = vweird.f32 %v177_v35 }
 0x12c   :  { %v180_v37 = vmul.f32 %v280_v34, %v179_v36 }
 0x12e   :  { %v181_v38 = vmul.f32 0.5, %v180_v37 }
 0x130   :  { %v182_v39 = vsub.f32 1.5, %v181_v38 }
 0x131   :  { %v282_v40 = vpop.eup %281 }
 0x132   :  { %v183_v41 = vmul.f32 %v280_v34, %v182_v39  ;;  %v189_v42 = vmul.f32 %v282_v40, %v177_v35  ;;  %vm195_vm3 = vweird.f32 %v282_v40 }
 0x133   :  { %vm196_vm5 = vmor %vm194_vm4, %vm195_vm3 }
 0x134   :  { %v190_v43 = vmul.f32 %v282_v40, %v189_v42  ;;  %v187_v44 = vsel %vm186_vm2, %v280_v34, %v183_v41 }
 0x135   :  { %v198_v49 = vmul.f32 %v187_v44, %v174_v46 }
 0x136   :  { %v191_v45 = vmul.f32 0.5, %v190_v43 }
 0x137   :  { %v203_v54 = vmul.f32 %v277_v48, %v198_v49 }
 0x138   :  { %v192_v47 = vsub.f32 1.5, %v191_v45 }
 0x139   :  { %v208_v57 = vadd.f32 %v278_v53, %v203_v54 }
 0x13a   :  { %v193_v50 = vmul.f32 %v282_v40, %v192_v47 }
 0x13c   :  { %v197_v52 = vsel %vm196_vm5, %v282_v40, %v193_v50 }
 0x13d   :  { %v199_v55 = vmul.f32 %v197_v52, %v175_v51 }
 0x13f   :  { %v204_v56 = vmul.f32 %v277_v48, %v199_v55 }
 0x141   :  { %v209_v58 = vadd.f32 %v278_v53, %v204_v56 }
 0x143   :  { %v271_v59 = vpack.c.bf16 %v209_v58, %v208_v57 }
 0x145   :  { %272 = vst [vmem:[%s374_s6] sm:$0xff] %v271_v59  }
 0x146   :  { %218 = vsyncpa [#allocation4], 1 }

// kernel: srp_decoder_layer_forward.9
= control target key start
LH: loop header
LB: loop body
LE: loop exit
PB: predicated region body
PF: predicated region fallthrough
CT: control target
= control target key end

     0   :  { %s814_s12 = smov 0   ;;  %s816_s13 = smov 0   ;;  %s910_s0 = inlined_call_operand.vmem [shape: bf16[2,8,384], index: 0, kind: input, shape index: {}, may-alias: {0,1,2}]   ;;  %s911_s1 = inlined_call_operand.vmem [shape: bf16[2,8,384], index: 1, kind: input, shape index: {}, may-alias: {0,1,2}]   ;;  %s912_s2 = inlined_call_operand.vmem [shape: bf16[2,8,384], index: 2, kind: input, shape index: {}, may-alias: {0,1,2}]   ;;  %s913_s3 = inlined_call_operand.vmem [shape: bf16[2,8,128], index: 3, kind: output, shape index: {}]  }
   0x1   :  { %s818_s14 = smov 0  }
   0x2 LB: > { %s25_s15 = sadd.s32 1, %s785_s13  ;;  %p702_p0 = scmp.ge.s32.totalorder %s789_s14, 1  ;;  %s789_s14 = sphi %s818_s14, %s13_s14   ;;  %s785_s13 = sphi %s816_s13, %s915_s13   ;;  %s781_s12 = sphi %s814_s12, %s914_s12  }
   0x3   : > { %p27_p1 = scmp.ge.s32.totalorder %s25_s15, 2  ;;  %p194_p2 = scmp.lt.s32.totalorder %s789_s14, 3 }
   0x5   : > { %s917_s15 = smov (%p27_p1, %s25_s15), 0  ;;  %p195_p3 = pnand %p702_p0, %p194_p2 }
   0x6   : > { %p241_p4 = scmp.lt.s32.totalorder (!%p195_p3), %s781_s12, 1  ;;  %s791_s24 = smov (!%p195_p3), 96  }
   0x7   : > { %198 = sbr.rel (%p195_p3) target bundleno = 1085 (0x43d), region = 32  ;;  %s792_s25 = smov (!%p195_p3), 64  }
   0x8   : > { %s793_s26 = smov (!%p195_p3), 32  }
   0xc   : > { %s919_s12 = smov (!%p241_p4, %s781_s12), 1  ;;  %vm280_vm0 = vcmask 261120   ;;  %vm300_vm1 = vcmask 64512   ;;  %vm330_vm2 = vcmask 1043456  }
   0xd   : > { %s835_s16 = smul.u32 12, %s919_s12  ;;  %s706_s4 = sshll.u32 %s919_s12, 2 }
   0xe   : > { %s275_s7 = scalar_lea.vmem %s913_s3, %s706_s4 }
   0xf   : > { %s718_s17 = sadd.s32 4, %s835_s16  ;;  %s248_s23 = scalar_lea.vmem %s910_s0, %s835_s16 }
  0x10   : > { %s257_s20 = scalar_lea.vmem %s911_s1, %s718_s17  ;;  %v277_v4 = vld [vmem:[%s248_s23] sm:$0xf]  ;;  %s720_s27 = sadd.s32 8, %s835_s16 }
  0x11   : > { %v278_v0 = vld [vmem:[%s257_s20] sm:$0xf]  ;;  %v348_v5 = vunpack.c.l.b16 %v277_v4  ;;  %s267_s30 = scalar_lea.vmem %s912_s2, %s720_s27 }
  0x12   : > { %v285_v1 = vsel %vm280_vm0, %v278_v0, 0  ;;  %v353_v2 = vunpack.c.l.b16 %v278_v0  ;;  %v279_v25 = vld [vmem:[%s267_s30] sm:$0xf] }
  0x13   : > { %294 = vmatpush.bf16.xpose.msra.mxu0 %v285_v1  ;;  %v349_v6 = vpack.c.b16 %v348_v5, %v348_v5  ;;  %v332_v27 = vsel %vm330_vm2, %v279_v25, 0  ;;  %v403_v38 = vunpack.c.l.b16 %v279_v25 }
  0x14   : > { %v354_v3 = vpack.c.b16 %v353_v2, %v353_v2  ;;  %341 = vmatpush.bf16.msra.mxu1 %v332_v27 }
  0x15   : > { %v404_v44 = vpack.c.b16 %v403_v38, %v403_v38 }
  0x16   : > { %355 = vrot.lane.b32.xlu1 %v354_v3, %s791_s24  ;;  %428 = vrot.lane.b32.xlu2 %v354_v3, %s792_s25 }
  0x1a   : > { %707 = vmatmul.msk.bf16.vlgmr.msra.gmra.mxu0 %vm280_vm0, %v277_v4 }
  0x1e   : > { %350 = vrot.lane.b32.xlu1 %v349_v6, %s791_s24  ;;  %498 = vrot.lane.b32.xlu2 %v354_v3, %s793_s26 }
  0x26   : > { %496 = vrot.lane.b32.xlu1 %v349_v6, %s793_s26 }
  0x70   : > { %v429_v13 = vpop.permute.xlu2 %428 }
  0x71   : > { %v434_v26 = vsel %vm280_vm0, %v429_v13, 0 }
  0x72   : > { %443 = vmatpush.bf16.xpose.msrb.mxu1 %v434_v26 }
  0x78   : > { %v499_v14 = vpop.permute.xlu2 %498 }
  0x79   : > { %v504_v15 = vsel %vm280_vm0, %v499_v14, 0 }
  0x7a   : > { %513 = vmatpush.bf16.xpose.msrb.mxu0 %v504_v15 }
  0x88   : > { %v356_v7 = vpop.permute.xlu1 %355 }
  0x89   : > { %v361_v8 = vsel %vm280_vm0, %v356_v7, 0 }
  0x8a   : > { %370 = vmatpush.bf16.xpose.msra.mxu2 %v361_v8 }
  0x90   : > { %v351_v9 = vpop.permute.xlu1 %350 }
  0x91   : > { %709 = vmatmul.msk.bf16.vlgmr.msra.gmra.mxu2 %vm280_vm0, %v351_v9 }
  0x97   : > { %v296_v10 = vpop.f32.mrf.mxu0 }
  0x98   : > { %v301_v11 = vsel %vm300_vm1, %v296_v10, -inf  ;;  %v497_v16 = vpop.permute.xlu1 %496 }
  0x99   : > { %302 = vmax.xlane.f32.xlu0 %v301_v11  ;;  %713 = vmatmul.msk.bf16.vlgmr.msrb.gmra.mxu0 %vm280_vm0, %v497_v16 }
  0x9f   : > { %v298_v12 = vpop.f32.mrf.mxu0 }
 0x10c   : > { %v303_v17 = vpop.xlane.xlu0 %302 }
 0x10d   : > { %v304_v18 = vsub.f32 %v296_v10, %v303_v17 }
 0x10f   : > { %v305_v19 = vmul.f32 1.442695, %v304_v18 }
 0x111   : > { %751 = vpow2.f32 %v305_v19 }
 0x114   : > { %v372_v20 = vpop.f32.mrf.mxu2 }
 0x115   : > { %v376_v21 = vsel %vm300_vm1, %v372_v20, -inf }
 0x116   : > { %377 = vmax.xlane.f32.xlu2 %v376_v21  ;;  %v515_v28 = vpop.f32.mrf.mxu0 }
 0x117   : > { %v752_v22 = vpop.eup %751  ;;  %v519_v29 = vsel %vm300_vm1, %v515_v28, -inf }
 0x118   : > { %v307_v23 = vsel %vm300_vm1, %v752_v22, 0.0 }
 0x119   : > { %308 = vadd.xlane.f32.xlu0 %v307_v23 }
 0x11c   : > { %v374_v24 = vpop.f32.mrf.mxu2 }
 0x11e   : > { %v517_v34 = vpop.f32.mrf.mxu0 }
 0x12d   : > { %426 = vrot.lane.b32.xlu0 %v349_v6, %s792_s25 }
 0x157   : > { %520 = vmax.xlane.f32.xlu0 %v519_v29 }
 0x16b   : > { %545 = vrot.lane.b32.xlu0 %v404_v44, %s793_s26 }
 0x189   : > { %v378_v30 = vpop.xlane.xlu2 %377 }
 0x18a   : > { %v379_v31 = vsub.f32 %v372_v20, %v378_v30 }
 0x18c   : > { %v309_v32 = vpop.xlane.xlu0 %308  ;;  %v380_v33 = vmul.f32 1.442695, %v379_v31 }
 0x18d   : > { %753 = vrcp.f32 %v309_v32  ;;  %v321_v41 = vand.u32 2147483648, %v309_v32  ;;  %v319_v43 = vand.u32 2147483647, %v309_v32  ;;  %vm315_vm4 = vweird.f32 %v309_v32 }
 0x18e   : > { %755 = vpow2.f32 %v380_v33 }
 0x18f   : > { %v322_v46 = vor.u32 1.1754944e-38, %v321_v41  ;;  %vm320_vm6 = vcmp.eq.f32.partialorder %v319_v43, 8.507059e+37 }
 0x193   : > { %v754_v35 = vpop.eup %753 }
 0x194   : > { %v867_v36 = vpop.eup %755  ;;  %v311_v37 = vmul.f32 %v754_v35, %v309_v32  ;;  %vm316_vm3 = vweird.f32 %v754_v35 }
 0x195   : > { %v382_v39 = vsel %vm300_vm1, %v867_v36, 0.0  ;;  %vm317_vm5 = vmor %vm315_vm4, %vm316_vm3 }
 0x196   : > { %v312_v40 = vsub.f32 1.0, %v311_v37  ;;  %383 = vadd.xlane.f32.xlu2 %v382_v39 }
 0x198   : > { %v313_v42 = vmul.f32 %v754_v35, %v312_v40 }
 0x19a   : > { %v314_v45 = vadd.f32 %v754_v35, %v313_v42 }
 0x19c   : > { %v318_v47 = vsel %vm317_vm5, %v754_v35, %v314_v45 }
 0x19d   : > { %v323_v48 = vsel %vm320_vm6, %v322_v46, %v318_v47  ;;  %vm581_vm6 = vcmask 785408  }
 0x19e   : > { %v325_v49 = vmul.f32 %v752_v22, %v323_v48 }
 0x19f   : > { %v427_v51 = vpop.permute.xlu0 %426 }
 0x1a0   : > { %v326_v50 = vpack.c.bf16 %v325_v49, %v325_v49 }
 0x1a2   : > { %708 = vmatmul.msk.bf16.vlgmr.msra.gmra.mxu1 %vm300_vm1, %v326_v50 }
 0x1b2   : > { %711 = vmatmul.msk.bf16.vlgmr.msrb.gmra.mxu1 %vm280_vm0, %v427_v51 }
 0x1ca   : > { %v521_v53 = vpop.xlane.xlu0 %520 }
 0x1cb   : > { %v522_v54 = vsub.f32 %v515_v28, %v521_v53 }
 0x1cd   : > { %v523_v56 = vmul.f32 1.442695, %v522_v54 }
 0x1cf   : > { %757 = vpow2.f32 %v523_v56 }
 0x1d5   : > { %v758_v59 = vpop.eup %757 }
 0x1d6   : > { %v525_v60 = vsel %vm300_vm1, %v758_v59, 0.0 }
 0x1dd   : > { %v546_v62 = vpop.permute.xlu0 %545 }
 0x1de   : > { %v551_v63 = vsel %vm330_vm2, %v546_v62, 0 }
 0x1df   : > { %560 = vmatpush.bf16.msrb.mxu2 %v551_v63 }
 0x209   : > { %v384_v18 = vpop.xlane.xlu2 %383 }
 0x20a   : > { %vm390_vm11 = vweird.f32 %v384_v18  ;;  %v396_v23 = vand.u32 2147483648, %v384_v18  ;;  %v394_v25 = vand.u32 2147483647, %v384_v18 }
 0x20c   : > { %v397_v26 = vor.u32 1.1754944e-38, %v396_v23  ;;  %vm395_vm14 = vcmp.eq.f32.partialorder %v394_v25, 8.507059e+37 }
 0x21f   : > { %v874_v52 = vpop.f32.mrf.mxu1 }
 0x227   : > { %v345_v55 = vpop.f32.mrf.mxu1 }
 0x22f   : > { %v445_v57 = vpop.f32.mrf.mxu1 }
 0x230   : > { %v449_v58 = vsel %vm300_vm1, %v445_v57, -inf }
 0x231   : > { %450 = vmax.xlane.f32.xlu1 %v449_v58 }
 0x237   : > { %v447_v61 = vpop.f32.mrf.mxu1 }
 0x239   : > { %526 = vadd.xlane.f32.xlu1 %v525_v60 }
 0x252   : > { %475 = vrot.lane.b32.xlu1 %v404_v44, %s792_s25 }
 0x2a4   : > { %v451_v0 = vpop.xlane.xlu1 %450 }
 0x2a5   : > { %v452_v1 = vsub.f32 %v445_v57, %v451_v0 }
 0x2a7   : > { %v453_v2 = vmul.f32 1.442695, %v452_v1 }
 0x2a9   : > { %759 = vpow2.f32 %v453_v2 }
 0x2ac   : > { %v527_v3 = vpop.xlane.xlu1 %526 }
 0x2ad   : > { %761 = vrcp.f32 %v527_v3  ;;  %v539_v9 = vand.u32 2147483648, %v527_v3  ;;  %v537_v11 = vand.u32 2147483647, %v527_v3  ;;  %vm533_vm8 = vweird.f32 %v527_v3 }
 0x2ae   : > { %763 = vrcp.f32 %v384_v18 }
 0x2af   : > { %v880_v4 = vpop.eup %759  ;;  %v540_v13 = vor.u32 1.1754944e-38, %v539_v9  ;;  %vm538_vm10 = vcmp.eq.f32.partialorder %v537_v11, 8.507059e+37 }
 0x2b0   : > { %v455_v5 = vsel %vm300_vm1, %v880_v4, 0.0 }
 0x2b1   : > { %456 = vadd.xlane.f32.xlu2 %v455_v5 }
 0x2b3   : > { %v762_v6 = vpop.eup %761 }
 0x2b4   : > { %v529_v7 = vmul.f32 %v762_v6, %v527_v3  ;;  %vm534_vm7 = vweird.f32 %v762_v6  ;;  %v764_v19 = vpop.eup %763 }
 0x2b5   : > { %vm535_vm9 = vmor %vm533_vm8, %vm534_vm7  ;;  %v386_v20 = vmul.f32 %v764_v19, %v384_v18  ;;  %vm391_vm12 = vweird.f32 %v764_v19 }
 0x2b6   : > { %v530_v8 = vsub.f32 1.0, %v529_v7  ;;  %vm392_vm13 = vmor %vm390_vm11, %vm391_vm12 }
 0x2b7   : > { %v387_v21 = vsub.f32 1.0, %v386_v20 }
 0x2b8   : > { %v531_v10 = vmul.f32 %v762_v6, %v530_v8 }
 0x2b9   : > { %v388_v22 = vmul.f32 %v764_v19, %v387_v21 }
 0x2ba   : > { %v532_v12 = vadd.f32 %v762_v6, %v531_v10 }
 0x2bb   : > { %v389_v24 = vadd.f32 %v764_v19, %v388_v22 }
 0x2bc   : > { %v536_v14 = vsel %vm535_vm9, %v762_v6, %v532_v12 }
 0x2bd   : > { %v541_v15 = vsel %vm538_vm10, %v540_v13, %v536_v14  ;;  %v393_v28 = vsel %vm392_vm13, %v764_v19, %v389_v24 }
 0x2be   : > { %v543_v16 = vmul.f32 %v758_v59, %v541_v15  ;;  %v398_v29 = vsel %vm395_vm14, %v397_v26, %v393_v28 }
 0x2bf   : > { %v400_v32 = vmul.f32 %v867_v36, %v398_v29 }
 0x2c0   : > { %v544_v17 = vpack.c.bf16 %v543_v16, %v543_v16 }
 0x2c1   : > { %v401_v39 = vpack.c.bf16 %v400_v32, %v400_v32 }
 0x2c2   : > { %714 = vmatmul.msk.bf16.vlgmr.msrb.gmra.mxu2 %vm300_vm1, %v544_v17 }
 0x2c4   : > { %v476_v30 = vpop.permute.xlu1 %475 }
 0x2c5   : > { %v481_v35 = vsel %vm330_vm2, %v476_v30, 0 }
 0x2c9   : > { %405 = vrot.lane.b32.xlu2 %v404_v44, %s791_s24 }
 0x324   : > { %v457_v27 = vpop.xlane.xlu2 %456 }
 0x325   : > { %765 = vrcp.f32 %v457_v27  ;;  %v469_v42 = vand.u32 2147483648, %v457_v27  ;;  %vm463_vm3 = vweird.f32 %v457_v27  ;;  %v467_v43 = vand.u32 2147483647, %v457_v27 }
 0x327   : > { %v470_v44 = vor.u32 1.1754944e-38, %v469_v42  ;;  %vm468_vm5 = vcmp.eq.f32.partialorder %v467_v43, 8.507059e+37 }
 0x32b   : > { %v766_v31 = vpop.eup %765 }
 0x32c   : > { %v459_v33 = vmul.f32 %v766_v31, %v457_v27  ;;  %v406_v34 = vpop.permute.xlu2 %405  ;;  %vm464_vm15 = vweird.f32 %v766_v31 }
 0x32d   : > { %v411_v37 = vsel %vm330_vm2, %v406_v34, 0  ;;  %vm465_vm4 = vmor %vm463_vm3, %vm464_vm15  ;;  %vm579_vm2 = vcmask 523264  }
 0x32e   : > { %v460_v38 = vsub.f32 1.0, %v459_v33  ;;  %420 = vmatpush.bf16.msra.mxu3 %v411_v37 }
 0x330   : > { %v461_v40 = vmul.f32 %v766_v31, %v460_v38 }
 0x331   : > { %710 = vmatmul.msk.bf16.vlgmr.msra.gmra.mxu3 %vm300_vm1, %v401_v39 }
 0x332   : > { %490 = vmatpush.bf16.msrb.mxu3 %v481_v35  ;;  %v462_v41 = vadd.f32 %v766_v31, %v461_v40 }
 0x334   : > { %v466_v36 = vsel %vm465_vm4, %v766_v31, %v462_v41 }
 0x335   : > { %v471_v45 = vsel %vm468_vm5, %v470_v44, %v466_v36 }
 0x336   : > { %v473_v46 = vmul.f32 %v880_v4, %v471_v45 }
 0x338   : > { %v474_v47 = vpack.c.bf16 %v473_v46, %v473_v46 }
 0x341   : > { %712 = vmatmul.msk.bf16.vlgmr.msrb.gmra.mxu3 %vm300_vm1, %v474_v47 }
 0x345   : > { %v562_v48 = vpop.f32.mrf.mxu2 }
 0x346   : > { %575 = vrot.lane.b32.xlu1 %v562_v48, %s791_s24 }
 0x34d   : > { %v564_v49 = vpop.f32.mrf.mxu2 }
 0x3b4   : > { %v422_v50 = vpop.f32.mrf.mxu3 }
 0x3b5   : > { %567 = vrot.lane.b32.xlu2 %v422_v50, %s793_s26 }
 0x3b8   : > { %v576_v58 = vpop.permute.xlu1 %575 }
 0x3bc   : > { %v424_v51 = vpop.f32.mrf.mxu3 }
 0x3c4   : > { %v492_v53 = vpop.f32.mrf.mxu3 }
 0x3c5   : > { %571 = vrot.lane.b32.xlu0 %v492_v53, %s792_s25 }
 0x3cc   : > { %v494_v54 = vpop.f32.mrf.mxu3 }
 0x40f   : > { %v568_v55 = vpop.permute.xlu2 %567 }
 0x410   : > { %v578_v56 = vsel %vm280_vm0, %v874_v52, %v568_v55 }
 0x437   : > { %v572_v57 = vpop.permute.xlu0 %571 }
 0x438   : > { %v580_v59 = vsel %vm579_vm2, %v578_v56, %v572_v57 }
 0x439   : > { %v582_v60 = vsel %vm581_vm6, %v580_v59, %v576_v58 }
 0x43a   : > { %v583_v61 = vpack.c.bf16 %v582_v60, %v582_v60 }
 0x43c   : > { %584 = vst [vmem:[%s275_s7] sm:$0xf] %v583_v61 }
 0x43d PF: > { %s13_s14 = sadd.s32 1, %s789_s14   ;;  %s914_s12 = smov %s785_s13 }
 0x43e   : > { %p10_p5 = scmp.ge.s32.totalorder %s13_s14, 4   ;;  %s915_s13 = smov %s917_s15 }
 0x440   :  { %12 = sbr.rel (!%p10_p5) target bundleno = 2 (0x2), region = 68 }

// kernel: srp_decoder_layer_forward.11
= control target key start
LH: loop header
LB: loop body
LE: loop exit
PB: predicated region body
PF: predicated region fallthrough
CT: control target
= control target key end

     0   :  { %8 = vsyncpa [#allocation4], 0  ;;  %s228_s15 = smov [#allocation3]   ;;  %s229_s17 = smov 64   ;;  %s263_s0 = inlined_call_operand.vmem [shape: bf16[16,128], index: 0, kind: input, shape index: {}]   ;;  %s264_s1 = inlined_call_operand.hbm [shape: bf16[128,128], index: 1, kind: input, shape index: {}]   ;;  %s265_s2 = inlined_call_operand.vmem [shape: f32[1,128], index: 2, kind: input, shape index: {}]   ;;  %s266_s3 = inlined_call_operand.vmem [shape: bf16[16,128], index: 3, kind: output, shape index: {}]  }
   0x1   :  { %s15_s14 = sshll.u32 %s264_s1, 4  ;;  %s17_s16 = sshll.u32 %s228_s15, 4  ;;  %s16_s14 = int_to_ptr.hbm [resolvable:$true] %s15_s14  ;;  %s18_s16 = int_to_ptr.vmem [resolvable:$true] %s17_s16 }
   0x2   :  { %s230_s18 = smov 4  }
   0x3   :  { %23 = dma.hbm_to_vmem [thread:$0]  %s16_s14, 1024, %s18_s16, [#allocation4], %s229_s17, %s229_s17, %s230_s18  }
   0x4   :  { %226 = dma.done.wait [#allocation4], 1024  }
   0x5   :  { %227 = vsyncadd [#allocation4], 4294966272  ;;  %v192_v0 = vld [vmem:[#allocation3 + $0x38] sm:$0xff]  ;;  %v191_v1 = vld [vmem:[#allocation3 + $0x30] sm:$0xff] }
   0x6   :  { %110 = vmatpush.bf16.msra.mxu0 %v192_v0  ;;  %v190_v2 = vld [vmem:[#allocation3 + $0x28] sm:$0xff]  ;;  %v189_v3 = vld [vmem:[#allocation3 + $0x20] sm:$0xff]  ;;  %v188_v4 = vld [vmem:[#allocation3 + $0x18] sm:$0xff] }
   0x7   :  { %v187_v5 = vld [vmem:[#allocation3 + $0x10] sm:$0xff]  ;;  %v186_v6 = vld [vmem:[#allocation3 + $0x8] sm:$0xff]  ;;  %v185_v7 = vld [vmem:[#allocation3] sm:$0xff] }
   0x8   :  { %v184_v8 = vld [vmem:[%s263_s0] sm:$0xff] }
   0x9   :  { %v201_v10 = vld [vmem:[%s265_s2] ss:$0 sm:$0xff] }
   0xa   :  { %111 = vmatpush.bf16.msra.mxu0 %v191_v1 }
   0xe   :  { %112 = vmatpush.bf16.msra.mxu0 %v190_v2 }
  0x12   :  { %113 = vmatpush.bf16.msra.mxu0 %v189_v3 }
  0x16   :  { %114 = vmatpush.bf16.msra.mxu0 %v188_v4 }
  0x1a   :  { %115 = vmatpush.bf16.msra.mxu0 %v187_v5 }
  0x1e   :  { %116 = vmatpush.bf16.msra.mxu0 %v186_v6 }
  0x22   :  { %117 = vmatpush.bf16.msra.mxu0 %v185_v7 }
  0x25   :  { %118 = vmatmul.bf16.vlgmr.msra.gmra.mxu0 %v184_v8 }
  0xa2   :  { %v119_v9 = vpop.f32.mrf.mxu0 }
  0xa3   :  { %v137_v12 = vadd.f32 %v201_v10, %v119_v9 }
  0xaa   :  { %v121_v11 = vpop.f32.mrf.mxu0 }
  0xab   :  { %v138_v13 = vadd.f32 %v201_v10, %v121_v11 }
  0xad   :  { %v196_v14 = vpack.c.bf16 %v138_v13, %v137_v12 }
  0xaf   :  { %197 = vst [vmem:[%s266_s3] sm:$0xff] %v196_v14  }
  0xb0   :  { %147 = vsyncpa [#allocation4], 1 }

// kernel: srp_decoder_layer_forward.8
= control target key start
LH: loop header
LB: loop body
LE: loop exit
PB: predicated region body
PF: predicated region fallthrough
CT: control target
= control target key end

     0   :  { %8 = vsyncpa [#allocation4], 0  ;;  %s458_s15 = smov [#allocation3]   ;;  %s459_s17 = smov 192   ;;  %s502_s0 = inlined_call_operand.vmem [shape: bf16[16,128], index: 0, kind: input, shape index: {}]   ;;  %s503_s1 = inlined_call_operand.hbm [shape: bf16[128,384], index: 1, kind: input, shape index: {}]   ;;  %s504_s2 = inlined_call_operand.vmem [shape: f32[1,384], index: 2, kind: input, shape index: {}]   ;;  %s505_s3 = inlined_call_operand.vmem [shape: bf16[16,384], index: 3, kind: output, shape index: {}]  }
   0x1   :  { %s15_s14 = sshll.u32 %s503_s1, 4  ;;  %s17_s16 = sshll.u32 %s458_s15, 4  ;;  %s16_s14 = int_to_ptr.hbm [resolvable:$true] %s15_s14  ;;  %s18_s16 = int_to_ptr.vmem [resolvable:$true] %s17_s16 }
   0x2   :  { %s460_s18 = smov 12  }
   0x3   :  { %23 = dma.hbm_to_vmem [thread:$0]  %s16_s14, 3072, %s18_s16, [#allocation4], %s459_s17, %s459_s17, %s460_s18  }
   0x4   :  { %456 = dma.done.wait [#allocation4], 3072  }
   0x5   :  { %457 = vsyncadd [#allocation4], 4294964224  ;;  %v394_v0 = vld [vmem:[#allocation3 + $0xa8] sm:$0xf]  ;;  %v427_v1 = vld [vmem:[#allocation3 + $0xb0] sm:$0xf0] }
   0x6   :  { %v426_v2 = vld [vmem:[#allocation3 + $0xac] sm:$0xf]  ;;  %v395_v3 = vor.u32 %v427_v1, %v394_v0  ;;  %v396_v4 = vld [vmem:[#allocation3 + $0xb4] sm:$0xf0]  ;;  %v402_v5 = vld [vmem:[#allocation3 + $0xb0] sm:$0xf] }
   0x7   :  { %v428_v6 = vld [vmem:[#allocation3 + $0xb8] sm:$0xf0]  ;;  %v399_v7 = vor.u32 %v426_v2, %v396_v4  ;;  %v382_v9 = vld [vmem:[#allocation3 + $0x90] sm:$0xf]  ;;  %v423_v11 = vld [vmem:[#allocation3 + $0x94] sm:$0xf] }
   0x8   :  { %v403_v8 = vor.u32 %v428_v6, %v402_v5  ;;  %v424_v10 = vld [vmem:[#allocation3 + $0x98] sm:$0xf0]  ;;  %214 = vmatpush.bf16.msra.mxu0 %v395_v3  ;;  %v384_v13 = vld [vmem:[#allocation3 + $0x9c] sm:$0xf0]  ;;  %v390_v14 = vld [vmem:[#allocation3 + $0x98] sm:$0xf] }
   0x9   :  { %v383_v12 = vor.u32 %v424_v10, %v382_v9  ;;  %v425_v15 = vld [vmem:[#allocation3 + $0xa0] sm:$0xf0]  ;;  %228 = vmatpush.bf16.msra.mxu1 %v399_v7  ;;  %v387_v16 = vor.u32 %v423_v11, %v384_v13  ;;  %v370_v18 = vld [vmem:[#allocation3 + $0x78] sm:$0xf]  ;;  %v420_v20 = vld [vmem:[#allocation3 + $0x7c] sm:$0xf] }
   0xa   :  { %242 = vmatpush.bf16.msra.mxu2 %v403_v8  ;;  %v391_v17 = vor.u32 %v425_v15, %v390_v14  ;;  %v421_v19 = vld [vmem:[#allocation3 + $0x80] sm:$0xf0]  ;;  %v372_v21 = vld [vmem:[#allocation3 + $0x84] sm:$0xf0]  ;;  %v378_v22 = vld [vmem:[#allocation3 + $0x80] sm:$0xf] }
   0xb   :  { %v422_v23 = vld [vmem:[#allocation3 + $0x88] sm:$0xf0]  ;;  %v371_v24 = vor.u32 %v421_v19, %v370_v18  ;;  %v375_v25 = vor.u32 %v420_v20, %v372_v21  ;;  %v358_v27 = vld [vmem:[#allocation3 + $0x60] sm:$0xf]  ;;  %v417_v29 = vld [vmem:[#allocation3 + $0x64] sm:$0xf] }
   0xc   :  { %215 = vmatpush.bf16.msra.mxu0 %v383_v12  ;;  %v379_v26 = vor.u32 %v422_v23, %v378_v22  ;;  %v418_v28 = vld [vmem:[#allocation3 + $0x68] sm:$0xf0]  ;;  %v360_v30 = vld [vmem:[#allocation3 + $0x6c] sm:$0xf0]  ;;  %v366_v31 = vld [vmem:[#allocation3 + $0x68] sm:$0xf] }
   0xd   :  { %229 = vmatpush.bf16.msra.mxu1 %v387_v16  ;;  %v419_v32 = vld [vmem:[#allocation3 + $0x70] sm:$0xf0]  ;;  %v359_v33 = vor.u32 %v418_v28, %v358_v27  ;;  %v363_v34 = vor.u32 %v417_v29, %v360_v30  ;;  %v346_v36 = vld [vmem:[#allocation3 + $0x48] sm:$0xf]  ;;  %v414_v38 = vld [vmem:[#allocation3 + $0x4c] sm:$0xf] }
   0xe   :  { %243 = vmatpush.bf16.msra.mxu2 %v391_v17  ;;  %v367_v35 = vor.u32 %v419_v32, %v366_v31  ;;  %v415_v37 = vld [vmem:[#allocation3 + $0x50] sm:$0xf0]  ;;  %v348_v39 = vld [vmem:[#allocation3 + $0x54] sm:$0xf0]  ;;  %v354_v40 = vld [vmem:[#allocation3 + $0x50] sm:$0xf] }
   0xf   :  { %v416_v41 = vld [vmem:[#allocation3 + $0x58] sm:$0xf0]  ;;  %v347_v42 = vor.u32 %v415_v37, %v346_v36  ;;  %v351_v43 = vor.u32 %v414_v38, %v348_v39  ;;  %v334_v45 = vld [vmem:[#allocation3 + $0x30] sm:$0xf]  ;;  %v411_v47 = vld [vmem:[#allocation3 + $0x34] sm:$0xf] }
  0x10   :  { %216 = vmatpush.bf16.msra.mxu0 %v371_v24  ;;  %v355_v44 = vor.u32 %v416_v41, %v354_v40  ;;  %v412_v46 = vld [vmem:[#allocation3 + $0x38] sm:$0xf0]  ;;  %v336_v48 = vld [vmem:[#allocation3 + $0x3c] sm:$0xf0]  ;;  %v342_v49 = vld [vmem:[#allocation3 + $0x38] sm:$0xf] }
  0x11   :  { %230 = vmatpush.bf16.msra.mxu1 %v375_v25  ;;  %v413_v50 = vld [vmem:[#allocation3 + $0x40] sm:$0xf0]  ;;  %v335_v51 = vor.u32 %v412_v46, %v334_v45  ;;  %v339_v52 = vor.u32 %v411_v47, %v336_v48  ;;  %v322_v54 = vld [vmem:[#allocation3 + $0x18] sm:$0xf]  ;;  %v408_v56 = vld [vmem:[#allocation3 + $0x1c] sm:$0xf] }
  0x12   :  { %244 = vmatpush.bf16.msra.mxu2 %v379_v26  ;;  %v343_v53 = vor.u32 %v413_v50, %v342_v49  ;;  %v409_v55 = vld [vmem:[#allocation3 + $0x20] sm:$0xf0]  ;;  %v324_v57 = vld [vmem:[#allocation3 + $0x24] sm:$0xf0]  ;;  %v330_v58 = vld [vmem:[#allocation3 + $0x20] sm:$0xf] }
  0x13   :  { %v410_v59 = vld [vmem:[#allocation3 + $0x28] sm:$0xf0]  ;;  %v323_v60 = vor.u32 %v409_v55, %v322_v54  ;;  %v327_v61 = vor.u32 %v408_v56, %v324_v57  ;;  %v310_v63 = vld [vmem:[#allocation3] sm:$0xf]  ;;  %v405_v1 = vld [vmem:[#allocation3 + $0x4] sm:$0xf] }
  0x14   :  { %217 = vmatpush.bf16.msra.mxu0 %v359_v33  ;;  %v331_v62 = vor.u32 %v410_v59, %v330_v58  ;;  %v406_v0 = vld [vmem:[#allocation3 + $0x8] sm:$0xf0]  ;;  %v312_v2 = vld [vmem:[#allocation3 + $0xc] sm:$0xf0]  ;;  %v318_v3 = vld [vmem:[#allocation3 + $0x8] sm:$0xf] }
  0x15   :  { %231 = vmatpush.bf16.msra.mxu1 %v363_v34  ;;  %v407_v4 = vld [vmem:[#allocation3 + $0x10] sm:$0xf0]  ;;  %v311_v5 = vor.u32 %v406_v0, %v310_v63  ;;  %v315_v6 = vor.u32 %v405_v1, %v312_v2  ;;  %v404_v8 = vld [vmem:[%s502_s0] sm:$0xff] }
  0x16   :  { %245 = vmatpush.bf16.msra.mxu2 %v367_v35  ;;  %v319_v7 = vor.u32 %v407_v4, %v318_v3  ;;  %v277_v9 = vld [vmem:[%s504_s2] sm:$0x7] }
  0x17   :  { %v279_v10 = vperm.slane %v277_v9, 0  ;;  %v280_v11 = vperm.slane %v277_v9, 1  ;;  %v281_v17 = vperm.slane %v277_v9, 2 }
  0x18   :  { %218 = vmatpush.bf16.msra.mxu0 %v347_v42 }
  0x19   :  { %232 = vmatpush.bf16.msra.mxu1 %v351_v43 }
  0x1a   :  { %246 = vmatpush.bf16.msra.mxu2 %v355_v44 }
  0x1c   :  { %219 = vmatpush.bf16.msra.mxu0 %v335_v51 }
  0x1d   :  { %233 = vmatpush.bf16.msra.mxu1 %v339_v52 }
  0x1e   :  { %247 = vmatpush.bf16.msra.mxu2 %v343_v53 }
  0x20   :  { %220 = vmatpush.bf16.msra.mxu0 %v323_v60 }
  0x21   :  { %234 = vmatpush.bf16.msra.mxu1 %v327_v61 }
  0x22   :  { %248 = vmatpush.bf16.msra.mxu2 %v331_v62 }
  0x24   :  { %221 = vmatpush.bf16.msra.mxu0 %v311_v5 }
  0x25   :  { %235 = vmatpush.bf16.msra.mxu1 %v315_v6 }
  0x26   :  { %249 = vmatpush.bf16.msra.mxu2 %v319_v7 }
  0x27   :  { %222 = vmatmul.bf16.vlgmr.msra.gmra.mxu0 %v404_v8 }
  0x28   :  { %236 = vmatmul.bf16.vlgmr.msra.gmra.mxu1 %v404_v8 }
  0x29   :  { %250 = vmatmul.bf16.vlgmr.msra.gmra.mxu2 %v404_v8 }
  0xa4   :  { %v223_v12 = vpop.f32.mrf.mxu0 }
  0xa5   :  { %v285_v13 = vadd.f32 %v279_v10, %v223_v12  ;;  %v237_v14 = vpop.f32.mrf.mxu1 }
  0xa6   :  { %v286_v15 = vadd.f32 %v280_v11, %v237_v14 }
  0xa8   :  { %v291_v16 = vpack.c.bf16 %v286_v15, %v285_v13 }
  0xaa   :  { %295 = vst [vmem:[%s505_s3] sm:$0xff] %v291_v16 }
  0xac   :  { %v251_v18 = vpop.f32.mrf.mxu2  ;;  %v225_v20 = vpop.f32.mrf.mxu0 }
  0xad   :  { %v287_v19 = vadd.f32 %v281_v17, %v251_v18  ;;  %v288_v21 = vadd.f32 %v279_v10, %v225_v20  ;;  %v239_v22 = vpop.f32.mrf.mxu1 }
  0xae   :  { %v289_v24 = vadd.f32 %v280_v11, %v239_v22 }
  0xaf   :  { %v292_v23 = vpack.c.bf16 %v287_v19, %v287_v19 }
  0xb0   :  { %v293_v25 = vpack.c.bf16 %v289_v24, %v288_v21 }
  0xb1   :  { %296 = vst [vmem:[%s505_s3 + $0x8] sm:$0xf] %v292_v23 }
  0xb2   :  { %297 = vst [vmem:[%s505_s3 + $0xc] sm:$0xff] %v293_v25 }
  0xb4   :  { %v253_v26 = vpop.f32.mrf.mxu2 }
  0xb5   :  { %v290_v27 = vadd.f32 %v281_v17, %v253_v26 }
  0xb7   :  { %v294_v28 = vpack.c.bf16 %v290_v27, %v290_v27 }
  0xb9   :  { %298 = vst [vmem:[%s505_s3 + $0x14] sm:$0xf] %v294_v28 }
  0xba   :  { %303 = vsyncpa [#allocation4], 1 }

// kernel: srp_decoder_layer_forward.13
= control target key start
LH: loop header
LB: loop body
LE: loop exit
PB: predicated region body
PF: predicated region fallthrough
CT: control target
= control target key end

     0   :  { %s800_s12 = smov 0   ;;  %s802_s13 = smov 0   ;;  %s899_s0 = inlined_call_operand.vmem [shape: bf16[2,8,128], index: 0, kind: input, shape index: {}]   ;;  %s900_s1 = inlined_call_operand.vmem [shape: bf16[2,8,256], index: 1, kind: input, shape index: {}, may-alias: {1,2}]   ;;  %s901_s2 = inlined_call_operand.vmem [shape: bf16[2,8,256], index: 2, kind: input, shape index: {}, may-alias: {1,2}]   ;;  %s902_s3 = inlined_call_operand.vmem [shape: bf16[2,8,128], index: 3, kind: output, shape index: {}]  }
   0x1   :  { %s804_s14 = smov 0  }
   0x2 LB: > { %s25_s15 = sadd.s32 1, %s771_s13  ;;  %p689_p0 = scmp.ge.s32.totalorder %s775_s14, 1  ;;  %s775_s14 = sphi %s804_s14, %s13_s14   ;;  %s771_s13 = sphi %s802_s13, %s904_s13   ;;  %s767_s12 = sphi %s800_s12, %s903_s12  }
   0x3   : > { %p27_p1 = scmp.ge.s32.totalorder %s25_s15, 2  ;;  %p189_p2 = scmp.lt.s32.totalorder %s775_s14, 3 }
   0x5   : > { %s906_s15 = smov (%p27_p1, %s25_s15), 0  ;;  %p190_p3 = pnand %p689_p0, %p189_p2 }
   0x6   : > { %p234_p4 = scmp.lt.s32.totalorder (!%p190_p3), %s767_s12, 1  ;;  %s777_s24 = smov (!%p190_p3), 96  }
   0x7   : > { %193 = sbr.rel (%p190_p3) target bundleno = 1083 (0x43b), region = 32  ;;  %s778_s25 = smov (!%p190_p3), 64  }
   0x8   : > { %s779_s26 = smov (!%p190_p3), 32  }
   0xc   : > { %s908_s12 = smov (!%p234_p4, %s767_s12), 1  ;;  %vm270_vm0 = vcmask 261120   ;;  %vm290_vm1 = vcmask 64512   ;;  %vm320_vm2 = vcmask 1043456  }
   0xd   : > { %s706_s16 = sshll.u32 %s908_s12, 3  ;;  %s690_s17 = sshll.u32 %s908_s12, 2 }
   0xe   : > { %s248_s20 = scalar_lea.vmem %s900_s1, %s706_s16  ;;  %s240_s23 = scalar_lea.vmem %s899_s0, %s690_s17 }
   0xf   : > { %v268_v0 = vld [vmem:[%s248_s20] sm:$0xf]  ;;  %s708_s27 = sadd.s32 4, %s706_s16  ;;  %s265_s6 = scalar_lea.vmem %s902_s3, %s690_s17 }
  0x10   : > { %v275_v1 = vsel %vm270_vm0, %v268_v0, 0  ;;  %v343_v2 = vunpack.c.l.b16 %v268_v0  ;;  %v267_v4 = vld [vmem:[%s240_s23] sm:$0xf]  ;;  %s257_s30 = scalar_lea.vmem %s901_s2, %s708_s27 }
  0x11   : > { %284 = vmatpush.bf16.xpose.msra.mxu0 %v275_v1  ;;  %v338_v5 = vunpack.c.l.b16 %v267_v4  ;;  %v269_v25 = vld [vmem:[%s257_s30] sm:$0xf] }
  0x12   : > { %v344_v3 = vpack.c.b16 %v343_v2, %v343_v2  ;;  %v322_v27 = vsel %vm320_vm2, %v269_v25, 0  ;;  %v393_v38 = vunpack.c.l.b16 %v269_v25 }
  0x13   : > { %v339_v6 = vpack.c.b16 %v338_v5, %v338_v5  ;;  %331 = vmatpush.bf16.msra.mxu1 %v322_v27 }
  0x14   : > { %345 = vrot.lane.b32.xlu1 %v344_v3, %s777_s24  ;;  %418 = vrot.lane.b32.xlu2 %v344_v3, %s778_s25  ;;  %v394_v44 = vpack.c.b16 %v393_v38, %v393_v38 }
  0x18   : > { %696 = vmatmul.msk.bf16.vlgmr.msra.gmra.mxu0 %vm270_vm0, %v267_v4 }
  0x1c   : > { %340 = vrot.lane.b32.xlu1 %v339_v6, %s777_s24  ;;  %488 = vrot.lane.b32.xlu2 %v344_v3, %s779_s26 }
  0x24   : > { %486 = vrot.lane.b32.xlu1 %v339_v6, %s779_s26 }
  0x6e   : > { %v419_v13 = vpop.permute.xlu2 %418 }
  0x6f   : > { %v424_v26 = vsel %vm270_vm0, %v419_v13, 0 }
  0x70   : > { %433 = vmatpush.bf16.xpose.msrb.mxu1 %v424_v26 }
  0x76   : > { %v489_v14 = vpop.permute.xlu2 %488 }
  0x77   : > { %v494_v15 = vsel %vm270_vm0, %v489_v14, 0 }
  0x78   : > { %503 = vmatpush.bf16.xpose.msrb.mxu0 %v494_v15 }
  0x86   : > { %v346_v7 = vpop.permute.xlu1 %345 }
  0x87   : > { %v351_v8 = vsel %vm270_vm0, %v346_v7, 0 }
  0x88   : > { %360 = vmatpush.bf16.xpose.msra.mxu2 %v351_v8 }
  0x8e   : > { %v341_v9 = vpop.permute.xlu1 %340 }
  0x8f   : > { %698 = vmatmul.msk.bf16.vlgmr.msra.gmra.mxu2 %vm270_vm0, %v341_v9 }
  0x95   : > { %v286_v10 = vpop.f32.mrf.mxu0 }
  0x96   : > { %v291_v11 = vsel %vm290_vm1, %v286_v10, -inf  ;;  %v487_v16 = vpop.permute.xlu1 %486 }
  0x97   : > { %292 = vmax.xlane.f32.xlu0 %v291_v11  ;;  %702 = vmatmul.msk.bf16.vlgmr.msrb.gmra.mxu0 %vm270_vm0, %v487_v16 }
  0x9d   : > { %v288_v12 = vpop.f32.mrf.mxu0 }
 0x10a   : > { %v293_v17 = vpop.xlane.xlu0 %292 }
 0x10b   : > { %v294_v18 = vsub.f32 %v286_v10, %v293_v17 }
 0x10d   : > { %v295_v19 = vmul.f32 1.442695, %v294_v18 }
 0x10f   : > { %737 = vpow2.f32 %v295_v19 }
 0x112   : > { %v362_v20 = vpop.f32.mrf.mxu2 }
 0x113   : > { %v366_v21 = vsel %vm290_vm1, %v362_v20, -inf }
 0x114   : > { %367 = vmax.xlane.f32.xlu2 %v366_v21  ;;  %v505_v28 = vpop.f32.mrf.mxu0 }
 0x115   : > { %v738_v22 = vpop.eup %737  ;;  %v509_v29 = vsel %vm290_vm1, %v505_v28, -inf }
 0x116   : > { %v297_v23 = vsel %vm290_vm1, %v738_v22, 0.0 }
 0x117   : > { %298 = vadd.xlane.f32.xlu0 %v297_v23 }
 0x11a   : > { %v364_v24 = vpop.f32.mrf.mxu2 }
 0x11c   : > { %v507_v34 = vpop.f32.mrf.mxu0 }
 0x12b   : > { %416 = vrot.lane.b32.xlu0 %v339_v6, %s778_s25 }
 0x155   : > { %510 = vmax.xlane.f32.xlu0 %v509_v29 }
 0x169   : > { %535 = vrot.lane.b32.xlu0 %v394_v44, %s779_s26 }
 0x187   : > { %v368_v30 = vpop.xlane.xlu2 %367 }
 0x188   : > { %v369_v31 = vsub.f32 %v362_v20, %v368_v30 }
 0x18a   : > { %v299_v32 = vpop.xlane.xlu0 %298  ;;  %v370_v33 = vmul.f32 1.442695, %v369_v31 }
 0x18b   : > { %739 = vrcp.f32 %v299_v32  ;;  %v311_v41 = vand.u32 2147483648, %v299_v32  ;;  %v309_v43 = vand.u32 2147483647, %v299_v32  ;;  %vm305_vm4 = vweird.f32 %v299_v32 }
 0x18c   : > { %741 = vpow2.f32 %v370_v33 }
 0x18d   : > { %v312_v46 = vor.u32 1.1754944e-38, %v311_v41  ;;  %vm310_vm6 = vcmp.eq.f32.partialorder %v309_v43, 8.507059e+37 }
 0x191   : > { %v740_v35 = vpop.eup %739 }
 0x192   : > { %v855_v36 = vpop.eup %741  ;;  %v301_v37 = vmul.f32 %v740_v35, %v299_v32  ;;  %vm306_vm3 = vweird.f32 %v740_v35 }
 0x193   : > { %v372_v39 = vsel %vm290_vm1, %v855_v36, 0.0  ;;  %vm307_vm5 = vmor %vm305_vm4, %vm306_vm3 }
 0x194   : > { %v302_v40 = vsub.f32 1.0, %v301_v37  ;;  %373 = vadd.xlane.f32.xlu2 %v372_v39 }
 0x196   : > { %v303_v42 = vmul.f32 %v740_v35, %v302_v40 }
 0x198   : > { %v304_v45 = vadd.f32 %v740_v35, %v303_v42 }
 0x19a   : > { %v308_v47 = vsel %vm307_vm5, %v740_v35, %v304_v45 }
 0x19b   : > { %v313_v48 = vsel %vm310_vm6, %v312_v46, %v308_v47  ;;  %vm571_vm6 = vcmask 785408  }
 0x19c   : > { %v315_v49 = vmul.f32 %v738_v22, %v313_v48 }
 0x19d   : > { %v417_v51 = vpop.permute.xlu0 %416 }
 0x19e   : > { %v316_v50 = vpack.c.bf16 %v315_v49, %v315_v49 }
 0x1a0   : > { %697 = vmatmul.msk.bf16.vlgmr.msra.gmra.mxu1 %vm290_vm1, %v316_v50 }
 0x1b0   : > { %700 = vmatmul.msk.bf16.vlgmr.msrb.gmra.mxu1 %vm270_vm0, %v417_v51 }
 0x1c8   : > { %v511_v53 = vpop.xlane.xlu0 %510 }
 0x1c9   : > { %v512_v54 = vsub.f32 %v505_v28, %v511_v53 }
 0x1cb   : > { %v513_v56 = vmul.f32 1.442695, %v512_v54 }
 0x1cd   : > { %743 = vpow2.f32 %v513_v56 }
 0x1d3   : > { %v744_v59 = vpop.eup %743 }
 0x1d4   : > { %v515_v60 = vsel %vm290_vm1, %v744_v59, 0.0 }
 0x1db   : > { %v536_v62 = vpop.permute.xlu0 %535 }
 0x1dc   : > { %v541_v63 = vsel %vm320_vm2, %v536_v62, 0 }
 0x1dd   : > { %550 = vmatpush.bf16.msrb.mxu2 %v541_v63 }
 0x207   : > { %v374_v18 = vpop.xlane.xlu2 %373 }
 0x208   : > { %vm380_vm11 = vweird.f32 %v374_v18  ;;  %v386_v23 = vand.u32 2147483648, %v374_v18  ;;  %v384_v25 = vand.u32 2147483647, %v374_v18 }
 0x20a   : > { %v387_v26 = vor.u32 1.1754944e-38, %v386_v23  ;;  %vm385_vm14 = vcmp.eq.f32.partialorder %v384_v25, 8.507059e+37 }
 0x21d   : > { %v862_v52 = vpop.f32.mrf.mxu1 }
 0x225   : > { %v335_v55 = vpop.f32.mrf.mxu1 }
 0x22d   : > { %v435_v57 = vpop.f32.mrf.mxu1 }
 0x22e   : > { %v439_v58 = vsel %vm290_vm1, %v435_v57, -inf }
 0x22f   : > { %440 = vmax.xlane.f32.xlu1 %v439_v58 }
 0x235   : > { %v437_v61 = vpop.f32.mrf.mxu1 }
 0x237   : > { %516 = vadd.xlane.f32.xlu1 %v515_v60 }
 0x250   : > { %465 = vrot.lane.b32.xlu1 %v394_v44, %s778_s25 }
 0x2a2   : > { %v441_v0 = vpop.xlane.xlu1 %440 }
 0x2a3   : > { %v442_v1 = vsub.f32 %v435_v57, %v441_v0 }
 0x2a5   : > { %v443_v2 = vmul.f32 1.442695, %v442_v1 }
 0x2a7   : > { %745 = vpow2.f32 %v443_v2 }
 0x2aa   : > { %v517_v3 = vpop.xlane.xlu1 %516 }
 0x2ab   : > { %747 = vrcp.f32 %v517_v3  ;;  %v529_v9 = vand.u32 2147483648, %v517_v3  ;;  %v527_v11 = vand.u32 2147483647, %v517_v3  ;;  %vm523_vm8 = vweird.f32 %v517_v3 }
 0x2ac   : > { %749 = vrcp.f32 %v374_v18 }
 0x2ad   : > { %v868_v4 = vpop.eup %745  ;;  %v530_v13 = vor.u32 1.1754944e-38, %v529_v9  ;;  %vm528_vm10 = vcmp.eq.f32.partialorder %v527_v11, 8.507059e+37 }
 0x2ae   : > { %v445_v5 = vsel %vm290_vm1, %v868_v4, 0.0 }
 0x2af   : > { %446 = vadd.xlane.f32.xlu2 %v445_v5 }
 0x2b1   : > { %v748_v6 = vpop.eup %747 }
 0x2b2   : > { %v519_v7 = vmul.f32 %v748_v6, %v517_v3  ;;  %vm524_vm7 = vweird.f32 %v748_v6  ;;  %v750_v19 = vpop.eup %749 }
 0x2b3   : > { %vm525_vm9 = vmor %vm523_vm8, %vm524_vm7  ;;  %v376_v20 = vmul.f32 %v750_v19, %v374_v18  ;;  %vm381_vm12 = vweird.f32 %v750_v19 }
 0x2b4   : > { %v520_v8 = vsub.f32 1.0, %v519_v7  ;;  %vm382_vm13 = vmor %vm380_vm11, %vm381_vm12 }
 0x2b5   : > { %v377_v21 = vsub.f32 1.0, %v376_v20 }
 0x2b6   : > { %v521_v10 = vmul.f32 %v748_v6, %v520_v8 }
 0x2b7   : > { %v378_v22 = vmul.f32 %v750_v19, %v377_v21 }
 0x2b8   : > { %v522_v12 = vadd.f32 %v748_v6, %v521_v10 }
 0x2b9   : > { %v379_v24 = vadd.f32 %v750_v19, %v378_v22 }
 0x2ba   : > { %v526_v14 = vsel %vm525_vm9, %v748_v6, %v522_v12 }
 0x2bb   : > { %v531_v15 = vsel %vm528_vm10, %v530_v13, %v526_v14  ;;  %v383_v28 = vsel %vm382_vm13, %v750_v19, %v379_v24 }
 0x2bc   : > { %v533_v16 = vmul.f32 %v744_v59, %v531_v15  ;;  %v388_v29 = vsel %vm385_vm14, %v387_v26, %v383_v28 }
 0x2bd   : > { %v390_v32 = vmul.f32 %v855_v36, %v388_v29 }
 0x2be   : > { %v534_v17 = vpack.c.bf16 %v533_v16, %v533_v16 }
 0x2bf   : > { %v391_v39 = vpack.c.bf16 %v390_v32, %v390_v32 }
 0x2c0   : > { %703 = vmatmul.msk.bf16.vlgmr.msrb.gmra.mxu2 %vm290_vm1, %v534_v17 }
 0x2c2   : > { %v466_v30 = vpop.permute.xlu1 %465 }
 0x2c3   : > { %v471_v35 = vsel %vm320_vm2, %v466_v30, 0 }
 0x2c7   : > { %395 = vrot.lane.b32.xlu2 %v394_v44, %s777_s24 }
 0x322   : > { %v447_v27 = vpop.xlane.xlu2 %446 }
 0x323   : > { %751 = vrcp.f32 %v447_v27  ;;  %v459_v42 = vand.u32 2147483648, %v447_v27  ;;  %vm453_vm3 = vweird.f32 %v447_v27  ;;  %v457_v43 = vand.u32 2147483647, %v447_v27 }
 0x325   : > { %v460_v44 = vor.u32 1.1754944e-38, %v459_v42  ;;  %vm458_vm5 = vcmp.eq.f32.partialorder %v457_v43, 8.507059e+37 }
 0x329   : > { %v752_v31 = vpop.eup %751 }
 0x32a   : > { %v449_v33 = vmul.f32 %v752_v31, %v447_v27  ;;  %v396_v34 = vpop.permute.xlu2 %395  ;;  %vm454_vm15 = vweird.f32 %v752_v31 }
 0x32b   : > { %v401_v37 = vsel %vm320_vm2, %v396_v34, 0  ;;  %vm455_vm4 = vmor %vm453_vm3, %vm454_vm15  ;;  %vm569_vm2 = vcmask 523264  }
 0x32c   : > { %v450_v38 = vsub.f32 1.0, %v449_v33  ;;  %410 = vmatpush.bf16.msra.mxu3 %v401_v37 }
 0x32e   : > { %v451_v40 = vmul.f32 %v752_v31, %v450_v38 }
 0x32f   : > { %699 = vmatmul.msk.bf16.vlgmr.msra.gmra.mxu3 %vm290_vm1, %v391_v39 }
 0x330   : > { %480 = vmatpush.bf16.msrb.mxu3 %v471_v35  ;;  %v452_v41 = vadd.f32 %v752_v31, %v451_v40 }
 0x332   : > { %v456_v36 = vsel %vm455_vm4, %v752_v31, %v452_v41 }
 0x333   : > { %v461_v45 = vsel %vm458_vm5, %v460_v44, %v456_v36 }
 0x334   : > { %v463_v46 = vmul.f32 %v868_v4, %v461_v45 }
 0x336   : > { %v464_v47 = vpack.c.bf16 %v463_v46, %v463_v46 }
 0x33f   : > { %701 = vmatmul.msk.bf16.vlgmr.msrb.gmra.mxu3 %vm290_vm1, %v464_v47 }
 0x343   : > { %v552_v48 = vpop.f32.mrf.mxu2 }
 0x344   : > { %565 = vrot.lane.b32.xlu1 %v552_v48, %s777_s24 }
 0x34b   : > { %v554_v49 = vpop.f32.mrf.mxu2 }
 0x3b2   : > { %v412_v50 = vpop.f32.mrf.mxu3 }
 0x3b3   : > { %557 = vrot.lane.b32.xlu2 %v412_v50, %s779_s26 }
 0x3b6   : > { %v566_v58 = vpop.permute.xlu1 %565 }
 0x3ba   : > { %v414_v51 = vpop.f32.mrf.mxu3 }
 0x3c2   : > { %v482_v53 = vpop.f32.mrf.mxu3 }
 0x3c3   : > { %561 = vrot.lane.b32.xlu0 %v482_v53, %s778_s25 }
 0x3ca   : > { %v484_v54 = vpop.f32.mrf.mxu3 }
 0x40d   : > { %v558_v55 = vpop.permute.xlu2 %557 }
 0x40e   : > { %v568_v56 = vsel %vm270_vm0, %v862_v52, %v558_v55 }
 0x435   : > { %v562_v57 = vpop.permute.xlu0 %561 }
 0x436   : > { %v570_v59 = vsel %vm569_vm2, %v568_v56, %v562_v57 }
 0x437   : > { %v572_v60 = vsel %vm571_vm6, %v570_v59, %v566_v58 }
 0x438   : > { %v573_v61 = vpack.c.bf16 %v572_v60, %v572_v60 }
 0x43a   : > { %574 = vst [vmem:[%s265_s6] sm:$0xf] %v573_v61 }
 0x43b PF: > { %s13_s14 = sadd.s32 1, %s775_s14   ;;  %s903_s12 = smov %s771_s13 }
 0x43c   : > { %p10_p5 = scmp.ge.s32.totalorder %s13_s14, 4   ;;  %s904_s13 = smov %s906_s15 }
 0x43e   :  { %12 = sbr.rel (!%p10_p5) target bundleno = 2 (0x2), region = 68 }

// kernel: srp_decoder_layer_forward.12
= control target key start
LH: loop header
LB: loop body
LE: loop exit
PB: predicated region body
PF: predicated region fallthrough
CT: control target
= control target key end

     0   :  { %8 = vsyncpa [#allocation4], 0  ;;  %s322_s15 = smov [#allocation3]   ;;  %s323_s17 = smov 128   ;;  %s360_s0 = inlined_call_operand.vmem [shape: bf16[16,128], index: 0, kind: input, shape index: {}]   ;;  %s361_s1 = inlined_call_operand.hbm [shape: bf16[128,256], index: 1, kind: input, shape index: {}]   ;;  %s362_s2 = inlined_call_operand.vmem [shape: f32[1,256], index: 2, kind: input, shape index: {}]   ;;  %s363_s3 = inlined_call_operand.vmem [shape: bf16[16,256], index: 3, kind: output, shape index: {}]  }
   0x1   :  { %s15_s14 = sshll.u32 %s361_s1, 4  ;;  %s17_s16 = sshll.u32 %s322_s15, 4  ;;  %s16_s14 = int_to_ptr.hbm [resolvable:$true] %s15_s14  ;;  %s18_s16 = int_to_ptr.vmem [resolvable:$true] %s17_s16 }
   0x2   :  { %s324_s18 = smov 8  }
   0x3   :  { %23 = dma.hbm_to_vmem [thread:$0]  %s16_s14, 2048, %s18_s16, [#allocation4], %s323_s17, %s323_s17, %s324_s18  }
   0x4   :  { %320 = dma.done.wait [#allocation4], 2048  }
   0x5   :  { %321 = vsyncadd [#allocation4], 4294965248  ;;  %v270_v0 = vld [vmem:[#allocation3 + $0x70] sm:$0xf]  ;;  %v292_v1 = vld [vmem:[#allocation3 + $0x74] sm:$0xf0] }
   0x6   :  { %v291_v2 = vld [vmem:[#allocation3 + $0x74] sm:$0xf]  ;;  %v271_v3 = vor.u32 %v292_v1, %v270_v0  ;;  %v272_v4 = vld [vmem:[#allocation3 + $0x78] sm:$0xf0]  ;;  %v262_v5 = vld [vmem:[#allocation3 + $0x60] sm:$0xf] }
   0x7   :  { %v290_v6 = vld [vmem:[#allocation3 + $0x64] sm:$0xf0]  ;;  %v275_v7 = vor.u32 %v291_v2, %v272_v4  ;;  %v289_v8 = vld [vmem:[#allocation3 + $0x64] sm:$0xf]  ;;  %v264_v9 = vld [vmem:[#allocation3 + $0x68] sm:$0xf0] }
   0x8   :  { %146 = vmatpush.bf16.msra.mxu0 %v271_v3  ;;  %v263_v10 = vor.u32 %v290_v6, %v262_v5  ;;  %v267_v11 = vor.u32 %v289_v8, %v264_v9  ;;  %v254_v12 = vld [vmem:[#allocation3 + $0x50] sm:$0xf]  ;;  %v288_v13 = vld [vmem:[#allocation3 + $0x54] sm:$0xf0]  ;;  %v287_v14 = vld [vmem:[#allocation3 + $0x54] sm:$0xf] }
   0x9   :  { %160 = vmatpush.bf16.msra.mxu1 %v275_v7  ;;  %v256_v15 = vld [vmem:[#allocation3 + $0x58] sm:$0xf0]  ;;  %v255_v16 = vor.u32 %v288_v13, %v254_v12  ;;  %v246_v18 = vld [vmem:[#allocation3 + $0x40] sm:$0xf]  ;;  %v286_v19 = vld [vmem:[#allocation3 + $0x44] sm:$0xf0] }
   0xa   :  { %v259_v17 = vor.u32 %v287_v14, %v256_v15  ;;  %v285_v20 = vld [vmem:[#allocation3 + $0x44] sm:$0xf]  ;;  %v248_v21 = vld [vmem:[#allocation3 + $0x48] sm:$0xf0]  ;;  %v247_v22 = vor.u32 %v286_v19, %v246_v18  ;;  %v238_v24 = vld [vmem:[#allocation3 + $0x30] sm:$0xf] }
   0xb   :  { %v251_v23 = vor.u32 %v285_v20, %v248_v21  ;;  %v284_v25 = vld [vmem:[#allocation3 + $0x34] sm:$0xf0]  ;;  %v283_v26 = vld [vmem:[#allocation3 + $0x34] sm:$0xf]  ;;  %v240_v27 = vld [vmem:[#allocation3 + $0x38] sm:$0xf0] }
   0xc   :  { %147 = vmatpush.bf16.msra.mxu0 %v263_v10  ;;  %v239_v28 = vor.u32 %v284_v25, %v238_v24  ;;  %v243_v29 = vor.u32 %v283_v26, %v240_v27  ;;  %v230_v30 = vld [vmem:[#allocation3 + $0x20] sm:$0xf]  ;;  %v282_v31 = vld [vmem:[#allocation3 + $0x24] sm:$0xf0]  ;;  %v281_v32 = vld [vmem:[#allocation3 + $0x24] sm:$0xf] }
   0xd   :  { %161 = vmatpush.bf16.msra.mxu1 %v267_v11  ;;  %v232_v33 = vld [vmem:[#allocation3 + $0x28] sm:$0xf0]  ;;  %v231_v34 = vor.u32 %v282_v31, %v230_v30  ;;  %v222_v36 = vld [vmem:[#allocation3 + $0x10] sm:$0xf]  ;;  %v280_v37 = vld [vmem:[#allocation3 + $0x14] sm:$0xf0] }
   0xe   :  { %v235_v35 = vor.u32 %v281_v32, %v232_v33  ;;  %v279_v38 = vld [vmem:[#allocation3 + $0x14] sm:$0xf]  ;;  %v224_v39 = vld [vmem:[#allocation3 + $0x18] sm:$0xf0]  ;;  %v223_v40 = vor.u32 %v280_v37, %v222_v36  ;;  %v214_v42 = vld [vmem:[#allocation3] sm:$0xf] }
   0xf   :  { %v227_v41 = vor.u32 %v279_v38, %v224_v39  ;;  %v278_v43 = vld [vmem:[#allocation3 + $0x4] sm:$0xf0]  ;;  %v277_v44 = vld [vmem:[#allocation3 + $0x4] sm:$0xf]  ;;  %v216_v45 = vld [vmem:[#allocation3 + $0x8] sm:$0xf0] }
  0x10   :  { %148 = vmatpush.bf16.msra.mxu0 %v255_v16  ;;  %v215_v46 = vor.u32 %v278_v43, %v214_v42  ;;  %v219_v47 = vor.u32 %v277_v44, %v216_v45  ;;  %v276_v48 = vld [vmem:[%s360_s0] sm:$0xff] }
  0x11   :  { %162 = vmatpush.bf16.msra.mxu1 %v259_v17  ;;  %v189_v49 = vld [vmem:[%s362_s2] sm:$0x3] }
  0x12   :  { %v191_v50 = vperm.slane %v189_v49, 0  ;;  %v192_v51 = vperm.slane %v189_v49, 1 }
  0x14   :  { %149 = vmatpush.bf16.msra.mxu0 %v247_v22 }
  0x15   :  { %163 = vmatpush.bf16.msra.mxu1 %v251_v23 }
  0x18   :  { %150 = vmatpush.bf16.msra.mxu0 %v239_v28 }
  0x19   :  { %164 = vmatpush.bf16.msra.mxu1 %v243_v29 }
  0x1c   :  { %151 = vmatpush.bf16.msra.mxu0 %v231_v34 }
  0x1d   :  { %165 = vmatpush.bf16.msra.mxu1 %v235_v35 }
  0x20   :  { %152 = vmatpush.bf16.msra.mxu0 %v223_v40 }
  0x21   :  { %166 = vmatpush.bf16.msra.mxu1 %v227_v41 }
  0x24   :  { %153 = vmatpush.bf16.msra.mxu0 %v215_v46 }
  0x25   :  { %167 = vmatpush.bf16.msra.mxu1 %v219_v47 }
  0x27   :  { %154 = vmatmul.bf16.vlgmr.msra.gmra.mxu0 %v276_v48 }
  0x28   :  { %168 = vmatmul.bf16.vlgmr.msra.gmra.mxu1 %v276_v48 }
  0xa4   :  { %v155_v52 = vpop.f32.mrf.mxu0 }
  0xa5   :  { %v195_v53 = vadd.f32 %v191_v50, %v155_v52  ;;  %v169_v54 = vpop.f32.mrf.mxu1 }
  0xa6   :  { %v196_v55 = vadd.f32 %v192_v51, %v169_v54 }
  0xa8   :  { %v199_v56 = vpack.c.bf16 %v196_v55, %v195_v53 }
  0xaa   :  { %201 = vst [vmem:[%s363_s3] sm:$0xff] %v199_v56 }
  0xac   :  { %v157_v57 = vpop.f32.mrf.mxu0 }
  0xad   :  { %v197_v58 = vadd.f32 %v191_v50, %v157_v57  ;;  %v171_v59 = vpop.f32.mrf.mxu1 }
  0xae   :  { %v198_v60 = vadd.f32 %v192_v51, %v171_v59 }
  0xb0   :  { %v200_v61 = vpack.c.bf16 %v198_v60, %v197_v58 }
  0xb2   :  { %202 = vst [vmem:[%s363_s3 + $0x8] sm:$0xff] %v200_v61 }
  0xb3   :  { %207 = vsyncpa [#allocation4], 1 }

// kernel: srp_decoder_layer_forward.15
= control target key start
LH: loop header
LB: loop body
LE: loop exit
PB: predicated region body
PF: predicated region fallthrough
CT: control target
= control target key end

     0   :  { %13 = vsyncpa [#allocation4], 0  ;;  %s773_s0 = inlined_call_operand.vmem [shape: bf16[16,128], index: 0, kind: input, shape index: {}, may-alias: {0,5}]   ;;  %s774_s1 = inlined_call_operand.hbm [shape: bf16[128,256], index: 1, kind: input, shape index: {}]   ;;  %s775_s2 = inlined_call_operand.vmem [shape: f32[1,256], index: 2, kind: input, shape index: {}]   ;;  %s776_s3 = inlined_call_operand.hbm [shape: bf16[256,128], index: 3, kind: input, shape index: {}]   ;;  %s777_s4 = inlined_call_operand.vmem [shape: f32[1,128], index: 4, kind: input, shape index: {}]   ;;  %s778_s5 = inlined_call_operand.vmem [shape: bf16[16,128], index: 5, kind: input, shape index: {}, may-alias: {0,5}]   ;;  %s779_s6 = inlined_call_operand.vmem [shape: f32[1,128], index: 6, kind: input, shape index: {}]   ;;  %s780_s7 = inlined_call_operand.vmem [shape: f32[1,128], index: 7, kind: input, shape index: {}]   ;;  %s781_s8 = inlined_call_operand.vmem [shape: bf16[16,128], index: 8, kind: output, shape index: {}]  }
   0x1   :  { %s21_s29 = sshll.u32 %s774_s1, 4  ;;  %s22_s29 = int_to_ptr.hbm [resolvable:$true] %s21_s29 }
   0x2   :  { %14 = vsyncpa [#allocation6], 0  ;;  %s695_s30 = smov [#allocation3]   ;;  %s36_s12 = sshll.u32 %s776_s3, 4  ;;  %s37_s12 = int_to_ptr.hbm [resolvable:$true] %s36_s12 }
   0x3   :  { %s23_s9 = sshll.u32 %s695_s30, 4  ;;  %s696_s13 = smov 128   ;;  %s24_s9 = int_to_ptr.vmem [resolvable:$true] %s23_s9 }
   0x4   :  { %s697_s14 = smov 8   ;;  %s698_s15 = smov [#allocation5]  }
   0x5   :  { %29 = dma.hbm_to_vmem [thread:$0]  %s22_s29, 2048, %s24_s9, [#allocation4], %s696_s13, %s696_s13, %s697_s14  }
   0x6   :  { %s38_s16 = sshll.u32 %s698_s15, 4  ;;  %s699_s17 = smov 64   ;;  %s39_s16 = int_to_ptr.vmem [resolvable:$true] %s38_s16 }
   0x7   :  { %s700_s18 = smov 4  }
   0x8   :  { %44 = dma.hbm_to_vmem [thread:$0]  %s37_s12, 2048, %s39_s16, [#allocation6], %s699_s17, %s699_s17, %s700_s18  }
   0x9   :  { %691 = dma.done.wait [#allocation4], 2048  }
   0xa   :  { %692 = vsyncadd [#allocation4], 4294965248 }
   0xb   :  { %693 = dma.done.wait [#allocation6], 2048  }
   0xc   :  { %694 = vsyncadd [#allocation6], 4294965248  ;;  %v518_v0 = vld [vmem:[#allocation3 + $0x70] sm:$0xf]  ;;  %v604_v1 = vld [vmem:[#allocation3 + $0x74] sm:$0xf0] }
   0xd   :  { %v603_v2 = vld [vmem:[#allocation3 + $0x74] sm:$0xf]  ;;  %v519_v3 = vor.u32 %v604_v1, %v518_v0  ;;  %v520_v4 = vld [vmem:[#allocation3 + $0x78] sm:$0xf0]  ;;  %v510_v5 = vld [vmem:[#allocation3 + $0x60] sm:$0xf] }
   0xe   :  { %v602_v6 = vld [vmem:[#allocation3 + $0x64] sm:$0xf0]  ;;  %v523_v7 = vor.u32 %v603_v2, %v520_v4  ;;  %v601_v8 = vld [vmem:[#allocation3 + $0x64] sm:$0xf]  ;;  %v512_v9 = vld [vmem:[#allocation3 + $0x68] sm:$0xf0] }
   0xf   :  { %177 = vmatpush.bf16.msra.mxu0 %v519_v3  ;;  %v511_v10 = vor.u32 %v602_v6, %v510_v5  ;;  %v515_v11 = vor.u32 %v601_v8, %v512_v9  ;;  %v502_v12 = vld [vmem:[#allocation3 + $0x50] sm:$0xf]  ;;  %v600_v13 = vld [vmem:[#allocation3 + $0x54] sm:$0xf0]  ;;  %v599_v14 = vld [vmem:[#allocation3 + $0x54] sm:$0xf] }
  0x10   :  { %191 = vmatpush.bf16.msra.mxu1 %v523_v7  ;;  %v504_v15 = vld [vmem:[#allocation3 + $0x58] sm:$0xf0]  ;;  %v503_v16 = vor.u32 %v600_v13, %v502_v12  ;;  %v494_v18 = vld [vmem:[#allocation3 + $0x40] sm:$0xf]  ;;  %v598_v19 = vld [vmem:[#allocation3 + $0x44] sm:$0xf0] }
  0x11   :  { %v507_v17 = vor.u32 %v599_v14, %v504_v15  ;;  %v597_v20 = vld [vmem:[#allocation3 + $0x44] sm:$0xf]  ;;  %v496_v21 = vld [vmem:[#allocation3 + $0x48] sm:$0xf0]  ;;  %v495_v22 = vor.u32 %v598_v19, %v494_v18  ;;  %v612_v23 = vld [vmem:[#allocation5 + $0x38] sm:$0xff] }
  0x12   :  { %v620_v24 = vld [vmem:[#allocation5 + $0x78] sm:$0xff]  ;;  %v499_v25 = vor.u32 %v597_v20, %v496_v21  ;;  %v486_v26 = vld [vmem:[#allocation3 + $0x30] sm:$0xf]  ;;  %v595_v28 = vld [vmem:[#allocation3 + $0x34] sm:$0xf]  ;;  %341 = vmatpush.bf16.msra.mxu2 %v612_v23 }
  0x13   :  { %178 = vmatpush.bf16.msra.mxu0 %v511_v10  ;;  %v596_v27 = vld [vmem:[#allocation3 + $0x34] sm:$0xf0]  ;;  %v488_v29 = vld [vmem:[#allocation3 + $0x38] sm:$0xf0]  ;;  %355 = vmatpush.bf16.msra.mxu3 %v620_v24  ;;  %v611_v30 = vld [vmem:[#allocation5 + $0x30] sm:$0xff] }
  0x14   :  { %192 = vmatpush.bf16.msra.mxu1 %v515_v11  ;;  %v619_v31 = vld [vmem:[#allocation5 + $0x70] sm:$0xff]  ;;  %v487_v32 = vor.u32 %v596_v27, %v486_v26  ;;  %v491_v33 = vor.u32 %v595_v28, %v488_v29  ;;  %v478_v34 = vld [vmem:[#allocation3 + $0x20] sm:$0xf]  ;;  %v594_v35 = vld [vmem:[#allocation3 + $0x24] sm:$0xf0] }
  0x15   :  { %v593_v36 = vld [vmem:[#allocation3 + $0x24] sm:$0xf]  ;;  %v480_v37 = vld [vmem:[#allocation3 + $0x28] sm:$0xf0]  ;;  %v479_v40 = vor.u32 %v594_v35, %v478_v34  ;;  %v470_v42 = vld [vmem:[#allocation3 + $0x10] sm:$0xf] }
  0x16   :  { %342 = vmatpush.bf16.msra.mxu2 %v611_v30  ;;  %v610_v38 = vld [vmem:[#allocation5 + $0x28] sm:$0xff]  ;;  %v483_v41 = vor.u32 %v593_v36, %v480_v37  ;;  %v592_v43 = vld [vmem:[#allocation3 + $0x14] sm:$0xf0]  ;;  %v591_v44 = vld [vmem:[#allocation3 + $0x14] sm:$0xf] }
  0x17   :  { %179 = vmatpush.bf16.msra.mxu0 %v503_v16  ;;  %356 = vmatpush.bf16.msra.mxu3 %v619_v31  ;;  %v618_v39 = vld [vmem:[#allocation5 + $0x68] sm:$0xff]  ;;  %v472_v45 = vld [vmem:[#allocation3 + $0x18] sm:$0xf0]  ;;  %v609_v46 = vld [vmem:[#allocation5 + $0x20] sm:$0xff]  ;;  %v471_v48 = vor.u32 %v592_v43, %v470_v42 }
  0x18   :  { %193 = vmatpush.bf16.msra.mxu1 %v507_v17  ;;  %v617_v47 = vld [vmem:[#allocation5 + $0x60] sm:$0xff]  ;;  %v475_v49 = vor.u32 %v591_v44, %v472_v45  ;;  %v590_v51 = vld [vmem:[#allocation3 + $0x4] sm:$0xf0]  ;;  %v464_v53 = vld [vmem:[#allocation3 + $0x8] sm:$0xf0] }
  0x19   :  { %v462_v50 = vld [vmem:[#allocation3] sm:$0xf]  ;;  %v589_v52 = vld [vmem:[#allocation3 + $0x4] sm:$0xf]  ;;  %v608_v57 = vld [vmem:[#allocation5 + $0x18] sm:$0xff] }
  0x1a   :  { %343 = vmatpush.bf16.msra.mxu2 %v610_v38  ;;  %v463_v54 = vor.u32 %v590_v51, %v462_v50  ;;  %v467_v55 = vor.u32 %v589_v52, %v464_v53  ;;  %v588_v56 = vld [vmem:[%s773_s0] sm:$0xff]  ;;  %v616_v58 = vld [vmem:[#allocation5 + $0x58] sm:$0xff]  ;;  %v607_v59 = vld [vmem:[#allocation5 + $0x10] sm:$0xff] }
  0x1b   :  { %180 = vmatpush.bf16.msra.mxu0 %v495_v22  ;;  %357 = vmatpush.bf16.msra.mxu3 %v618_v39  ;;  %v615_v60 = vld [vmem:[#allocation5 + $0x50] sm:$0xff]  ;;  %v606_v61 = vld [vmem:[#allocation5 + $0x8] sm:$0xff]  ;;  %v605_v63 = vld [vmem:[#allocation5] sm:$0xff] }
  0x1c   :  { %194 = vmatpush.bf16.msra.mxu1 %v499_v25  ;;  %v614_v62 = vld [vmem:[#allocation5 + $0x48] sm:$0xff]  ;;  %v613_v0 = vld [vmem:[#allocation5 + $0x40] sm:$0xff] }
  0x1d   :  { %v85_v1 = vld [vmem:[%s775_s2] sm:$0x3] }
  0x1e   :  { %344 = vmatpush.bf16.msra.mxu2 %v609_v46  ;;  %v87_v4 = vperm.slane %v85_v1, 0  ;;  %v88_v5 = vperm.slane %v85_v1, 1  ;;  %v622_v18 = vld [vmem:[%s778_s5] sm:$0xff]  }
  0x1f   :  { %181 = vmatpush.bf16.msra.mxu0 %v487_v32  ;;  %358 = vmatpush.bf16.msra.mxu3 %v617_v47  ;;  %v636_v20 = vld [vmem:[%s777_s4] ss:$0 sm:$0xff]  ;;  %v623_v23 = vunpack.c.l.bf16 %v622_v18  ;;  %v624_v30 = vunpack.c.h.bf16 %v622_v18 }
  0x20   :  { %195 = vmatpush.bf16.msra.mxu1 %v491_v33 }
  0x22   :  { %345 = vmatpush.bf16.msra.mxu2 %v608_v57 }
  0x23   :  { %182 = vmatpush.bf16.msra.mxu0 %v479_v40  ;;  %359 = vmatpush.bf16.msra.mxu3 %v616_v58 }
  0x24   :  { %196 = vmatpush.bf16.msra.mxu1 %v483_v41 }
  0x26   :  { %346 = vmatpush.bf16.msra.mxu2 %v607_v59 }
  0x27   :  { %183 = vmatpush.bf16.msra.mxu0 %v471_v48  ;;  %360 = vmatpush.bf16.msra.mxu3 %v615_v60 }
  0x28   :  { %197 = vmatpush.bf16.msra.mxu1 %v475_v49 }
  0x2a   :  { %347 = vmatpush.bf16.msra.mxu2 %v606_v61  ;;  %v637_v61 = vld [vmem:[%s779_s6] ss:$0 sm:$0xff] }
  0x2b   :  { %184 = vmatpush.bf16.msra.mxu0 %v463_v54  ;;  %361 = vmatpush.bf16.msra.mxu3 %v614_v62 }
  0x2c   :  { %198 = vmatpush.bf16.msra.mxu1 %v467_v55 }
  0x2e   :  { %185 = vmatmul.bf16.vlgmr.msra.gmra.mxu0 %v588_v56  ;;  %348 = vmatpush.bf16.msra.mxu2 %v605_v63 }
  0x2f   :  { %199 = vmatmul.bf16.vlgmr.msra.gmra.mxu1 %v588_v56  ;;  %362 = vmatpush.bf16.msra.mxu3 %v613_v0 }
  0xab   :  { %v186_v2 = vpop.f32.mrf.mxu0 }
  0xac   :  { %v200_v3 = vpop.f32.mrf.mxu1  ;;  %v187_v6 = vadd.f32 %v186_v2, %v87_v4  ;;  %v638_v2 = vld [vmem:[%s780_s7] ss:$0 sm:$0xff] }
  0xad   :  { %v201_v7 = vadd.f32 %v200_v3, %v88_v5 }
  0xae   :  { %v205_v12 = vmax.f32 %v187_v6, 0.0 }
  0xaf   :  { %v206_v14 = vmax.f32 %v201_v7, 0.0 }
  0xb3   :  { %v188_v8 = vpop.f32.mrf.mxu0 }
  0xb4   :  { %v189_v9 = vadd.f32 %v188_v8, %v87_v4  ;;  %v202_v10 = vpop.f32.mrf.mxu1 }
  0xb5   :  { %v203_v11 = vadd.f32 %v202_v10, %v88_v5 }
  0xb6   :  { %v207_v13 = vmax.f32 %v189_v9, 0.0 }
  0xb7   :  { %v208_v15 = vmax.f32 %v203_v11, 0.0 }
  0xb8   :  { %v211_v16 = vpack.c.bf16 %v207_v13, %v205_v12 }
  0xb9   :  { %v212_v17 = vpack.c.bf16 %v208_v15, %v206_v14 }
  0xba   :  { %349 = vmatmul.bf16.vlgmr.msra.gmra.mxu2 %v211_v16 }
  0xbb   :  { %363 = vmatmul.bf16.vlgmr.msra.gmra.mxu3 %v212_v17 }
 0x13d   :  { %v350_v19 = vpop.f32.mrf.mxu2 }
 0x13e   :  { %v364_v21 = vpop.f32.mrf.mxu3 }
 0x13f   :  { %v365_v22 = vadd.f32 %v364_v21, %v350_v19 }
 0x141   :  { %v382_v24 = vadd.f32 %v636_v20, %v365_v22 }
 0x143   :  { %v388_v25 = vadd.f32 %v623_v23, %v382_v24 }
 0x145   :  { %392 = vadd.xlane.f32.xlu0 %v388_v25  ;;  %v352_v26 = vpop.f32.mrf.mxu2  ;;  %v396_v27 = vmul.f32 %v388_v25, %v388_v25 }
 0x146   :  { %v366_v28 = vpop.f32.mrf.mxu3 }
 0x147   :  { %v367_v29 = vadd.f32 %v366_v28, %v352_v26  ;;  %398 = vadd.xlane.f32.xlu1 %v396_v27 }
 0x149   :  { %v383_v31 = vadd.f32 %v636_v20, %v367_v29 }
 0x14b   :  { %v389_v32 = vadd.f32 %v624_v30, %v383_v31 }
 0x14d   :  { %394 = vadd.xlane.f32.xlu0 %v389_v32  ;;  %v397_v33 = vmul.f32 %v389_v32, %v389_v32 }
 0x14f   :  { %400 = vadd.xlane.f32.xlu1 %v397_v33 }
 0x1b8   :  { %v393_v34 = vpop.xlane.xlu0 %392 }
 0x1b9   :  { %v402_v35 = vmul.f32 0.0078125, %v393_v34 }
 0x1ba   :  { %v399_v36 = vpop.xlane.xlu1 %398 }
 0x1bb   :  { %v406_v37 = vmul.f32 %v402_v35, %v402_v35  ;;  %v404_v38 = vmul.f32 0.0078125, %v399_v36  ;;  %v410_v59 = vsub.f32 %v388_v25, %v402_v35 }
 0x1bd   :  { %v408_v39 = vsub.f32 %v404_v38, %v406_v37 }
 0x1bf   :  { %v412_v40 = vadd.f32 1e-05, %v408_v39 }
 0x1c0   :  { %v395_v41 = vpop.xlane.xlu0 %394 }
 0x1c1   :  { %639 = vrsqrt.f32 %v412_v40  ;;  %v403_v42 = vmul.f32 0.0078125, %v395_v41  ;;  %vm420_vm1 = vweird.f32 %v412_v40 }
 0x1c2   :  { %v401_v43 = vpop.xlane.xlu1 %400 }
 0x1c3   :  { %v407_v44 = vmul.f32 %v403_v42, %v403_v42  ;;  %v405_v45 = vmul.f32 0.0078125, %v401_v43  ;;  %v411_v0 = vsub.f32 %v389_v32, %v403_v42 }
 0x1c5   :  { %v409_v46 = vsub.f32 %v405_v45, %v407_v44 }
 0x1c7   :  { %v640_v47 = vpop.eup %639  ;;  %v413_v48 = vadd.f32 1e-05, %v409_v46 }
 0x1c8   :  { %v415_v49 = vmul.f32 %v640_v47, %v412_v40  ;;  %vm421_vm0 = vweird.f32 %v640_v47 }
 0x1c9   :  { %641 = vrsqrt.f32 %v413_v48  ;;  %vm422_vm2 = vmor %vm420_vm1, %vm421_vm0  ;;  %vm430_vm4 = vweird.f32 %v413_v48 }
 0x1ca   :  { %v416_v50 = vmul.f32 %v640_v47, %v415_v49 }
 0x1cc   :  { %v417_v51 = vmul.f32 0.5, %v416_v50 }
 0x1ce   :  { %v418_v52 = vsub.f32 1.5, %v417_v51 }
 0x1cf   :  { %v642_v53 = vpop.eup %641 }
 0x1d0   :  { %v419_v54 = vmul.f32 %v640_v47, %v418_v52  ;;  %v425_v55 = vmul.f32 %v642_v53, %v413_v48  ;;  %vm431_vm3 = vweird.f32 %v642_v53 }
 0x1d1   :  { %vm432_vm5 = vmor %vm430_vm4, %vm431_vm3 }
 0x1d2   :  { %v426_v56 = vmul.f32 %v642_v53, %v425_v55  ;;  %v423_v57 = vsel %vm422_vm2, %v640_v47, %v419_v54 }
 0x1d3   :  { %v434_v62 = vmul.f32 %v423_v57, %v410_v59 }
 0x1d4   :  { %v427_v58 = vmul.f32 0.5, %v426_v56 }
 0x1d5   :  { %v439_v3 = vmul.f32 %v637_v61, %v434_v62 }
 0x1d6   :  { %v428_v60 = vsub.f32 1.5, %v427_v58 }
 0x1d7   :  { %v444_v6 = vadd.f32 %v638_v2, %v439_v3 }
 0x1d8   :  { %v429_v63 = vmul.f32 %v642_v53, %v428_v60 }
 0x1da   :  { %v433_v1 = vsel %vm432_vm5, %v642_v53, %v429_v63 }
 0x1db   :  { %v435_v4 = vmul.f32 %v433_v1, %v411_v0 }
 0x1dd   :  { %v440_v5 = vmul.f32 %v637_v61, %v435_v4 }
 0x1df   :  { %v445_v7 = vadd.f32 %v638_v2, %v440_v5 }
 0x1e1   :  { %v628_v8 = vpack.c.bf16 %v445_v7, %v444_v6 }
 0x1e3   :  { %629 = vst [vmem:[%s781_s8] sm:$0xff] %v628_v8  }
 0x1e4   :  { %454 = vsyncpa [#allocation4], 1 }
 0x1e5   :  { %455 = vsyncpa [#allocation6], 1 }

</bundles_post_ra>
